<compile_context>
chip_gen: v5e
topology: v5e:2x2
jax: 0.10.0
libtpu: 0.0.40
codegen_flags: <defaults>
</compile_context>

<pallas_src>
import functools

import jax
import jax.numpy as jnp
import numpy as np
from jax.experimental import pallas as pl
from jax.experimental.pallas import tpu as pltpu


# ----------------------------------------------------------------------------
# Fused kernel.  Activations live as (C, P) with P = T*H*W in the lane axis.
# ----------------------------------------------------------------------------
def _bottleneck_kernel(x_ref, masks_ref, wa_ref, ba_ref, wb_ref, bb_ref,
                       wc_ref, wsk_ref, bcs_ref, o_ref, *, H, W):
    HW = H * W
    P = x_ref.shape[-1]
    f32 = jnp.float32

    x = x_ref[0].astype(f32)                          # (Cin, P)

    def pad_lanes(v, pad):
        z = jnp.zeros((v.shape[0], pad), f32)
        return jnp.concatenate([z, v, z], axis=1)     # (C, pad + P + pad)

    def tap(vp, pad, off):
        # position p of the result holds the original position p + off,
        # with zeros where p + off falls outside [0, P).
        return vp[:, pad + off: pad + off + P]

    # ---- conv a: k=(3,1,1), pad=(1,0,0); temporal taps are shifts of +-HW ---
    xp = pad_lanes(x, HW)
    x_stack = jnp.concatenate([tap(xp, HW, -HW), x, tap(xp, HW, HW)], axis=0)
    a = jnp.dot(wa_ref[...], x_stack, preferred_element_type=f32) + ba_ref[...]
    a = jnp.maximum(a, 0.0)                           # (Cint, P)

    # ---- conv b: k=(1,3,3), pad=(0,1,1) at stride 1 (stride in wrapper) -----
    PAD = 128                                         # lane-chunk aligned, > W+1
    ap = pad_lanes(a, PAD)
    a_taps = []
    for kh in range(3):
        for kw in range(3):
            oh, ow = kh - 1, kw - 1
            if (oh, ow) == (0, 0):
                a_taps.append(a)
            else:
                k = kh * 3 + kw
                tp = tap(ap, PAD, oh * W + ow)
                # zero samples whose (h, w) source fell outside the image
                a_taps.append(tp * masks_ref[k:k + 1, :])
    a_stack = jnp.concatenate(a_taps, axis=0)         # (9*Cint, P)
    b = jnp.dot(wb_ref[...], a_stack, preferred_element_type=f32) + bb_ref[...]
    b = jnp.maximum(b, 0.0)                           # (Cint, P)

    # ---- conv c (1x1x1) + skip (1x1x1) + residual ReLU ----------------------
    y = (jnp.dot(wc_ref[...], b, preferred_element_type=f32)
         + jnp.dot(wsk_ref[...], x, preferred_element_type=f32)
         + bcs_ref[...])
    o_ref[0] = jnp.maximum(y, 0.0).astype(o_ref.dtype)


# ----------------------------------------------------------------------------
# Glue: BN folding, tap masks, pallas_call wrapper.
# ----------------------------------------------------------------------------
def _conv_b_masks(T, H, W):
    """(9, T*H*W) f32 validity masks for the 9 spatial taps of the 1x3x3 conv."""
    h = np.broadcast_to(np.arange(H).reshape(1, H, 1), (T, H, W)).reshape(-1)
    w = np.broadcast_to(np.arange(W).reshape(1, 1, W), (T, H, W)).reshape(-1)
    masks = []
    for kh in range(3):
        for kw in range(3):
            oh, ow = kh - 1, kw - 1
            valid = (h + oh >= 0) & (h + oh < H) & (w + ow >= 0) & (w + ow < W)
            masks.append(valid)
    return jnp.asarray(np.stack(masks).astype(np.float32))


def fold_params(p, eps=1e-5):
    """Fold inference-mode BatchNorm3d into the bias-free conv weights and
    flatten the conv kernels for the tap-stacked (im2col) matmuls."""
    def fold(w2d, bn):
        s = bn["gamma"] / jnp.sqrt(bn["var"] + eps)
        return w2d * s[:, None], (bn["beta"] - s * bn["mean"])[:, None]

    Cint, Cin = p["wa"].shape[0], p["wa"].shape[1]
    Cout = p["wc"].shape[0]
    # conv a: (Cint, Cin, 3, 1, 1) -> (Cint, 3*Cin), taps ordered kt = 0, 1, 2
    wa = jnp.transpose(p["wa"][:, :, :, 0, 0], (0, 2, 1)).reshape(Cint, 3 * Cin)
    # conv b: (Cint, Cint, 1, 3, 3) -> (Cint, 9*Cint), taps row-major (kh, kw)
    wb = jnp.transpose(p["wb"][:, :, 0, :, :], (0, 2, 3, 1)).reshape(Cint, 9 * Cint)
    wc = p["wc"][:, :, 0, 0, 0]
    wsk = p["wskip"][:, :, 0, 0, 0]
    wa_f, ba_f = fold(wa, p["bn_a"])
    wb_f, bb_f = fold(wb, p["bn_b"])
    wc_f, bc_f = fold(wc, p["bn_c"])
    wsk_f, bsk_f = fold(wsk, p["bn_skip"])
    return dict(wa=wa_f, ba=ba_f, wb=wb_f, bb=bb_f, wc=wc_f, wsk=wsk_f,
                bcs=bc_f + bsk_f)


def bottleneck_forward(x, params, *, stride):
    """x: (N, C_in, T, H, W) float32 (PyTorch NCDHW layout).
    Returns (N, C_out, T, ceil(H/stride), ceil(W/stride))."""
    N, Cin, T, H, W = x.shape
    P = T * H * W
    fp = fold_params(params)
    Cint = fp["wa"].shape[0]
    Cout = fp["wc"].shape[0]
    masks = _conv_b_masks(T, H, W)                    # (9, P) constant

    kernel = functools.partial(_bottleneck_kernel, H=H, W=W)

    def full_spec(shape):
        return pl.BlockSpec(shape, lambda n: (0,) * len(shape))

    y_flat = pl.pallas_call(
        kernel,
        out_shape=jax.ShapeDtypeStruct((N, Cout, P), x.dtype),
        grid=(N,),
        in_specs=[
            pl.BlockSpec((1, Cin, P), lambda n: (n, 0, 0)),   # x
            full_spec((9, P)),                                # conv-b tap masks
            full_spec((Cint, 3 * Cin)),                       # folded W_a
            full_spec((Cint, 1)),                             # folded b_a
            full_spec((Cint, 9 * Cint)),                      # folded W_b
            full_spec((Cint, 1)),                             # folded b_b
            full_spec((Cout, Cint)),                          # folded W_c
            full_spec((Cout, Cin)),                           # folded W_skip
            full_spec((Cout, 1)),                             # folded b_c + b_skip
        ],
        out_specs=pl.BlockSpec((1, Cout, P), lambda n: (n, 0, 0)),
        compiler_params=pltpu.CompilerParams(dimension_semantics=("parallel",)),
    )(x.reshape(N, Cin, P), masks, fp["wa"], fp["ba"], fp["wb"], fp["bb"],
      fp["wc"], fp["wsk"], fp["bcs"])

    y = y_flat.reshape(N, Cout, T, H, W)              # free reshape (contiguous)
    if stride > 1:
        # The strided (1,3,3) conv and the strided 1x1 skip sample the
        # stride-1 results at (h, w) = (s*i, s*j); everything after them is
        # pointwise, so subsampling the fused full-resolution output here is
        # exactly equivalent (cheap XLA slice; skipped when stride == 1).
        y = y[:, :, :, ::stride, ::stride]
    return y


# ----------------------------------------------------------------------------
# Parameter init (PyTorch-shaped conv weights + BN running stats).
# ----------------------------------------------------------------------------
def init_params(key, in_dim, int_dim, out_dim):
    ks = jax.random.split(key, 8)

    def bn(k, c):
        k1, k2, k3, k4 = jax.random.split(k, 4)
        return dict(gamma=0.5 + jax.random.uniform(k1, (c,), jnp.float32),
                    beta=0.1 * jax.random.normal(k2, (c,), jnp.float32),
                    mean=0.1 * jax.random.normal(k3, (c,), jnp.float32),
                    var=0.5 + jax.random.uniform(k4, (c,), jnp.float32))

    return dict(
        wskip=0.1 * jax.random.normal(ks[0], (out_dim, in_dim, 1, 1, 1), jnp.float32),
        bn_skip=bn(ks[1], out_dim),
        wa=0.1 * jax.random.normal(ks[2], (int_dim, in_dim, 3, 1, 1), jnp.float32),
        bn_a=bn(ks[3], int_dim),
        wb=0.1 * jax.random.normal(ks[4], (int_dim, int_dim, 1, 3, 3), jnp.float32),
        bn_b=bn(ks[5], int_dim),
        wc=0.1 * jax.random.normal(ks[6], (out_dim, int_dim, 1, 1, 1), jnp.float32),
        bn_c=bn(ks[7], out_dim),
    )


if __name__ == "__main__":
    key = jax.random.PRNGKey(0)
    kp, kx = jax.random.split(key)

    N, in_dim, int_dim, out_dim = 2, 16, 8, 32
    T, H, W, stride = 4, 16, 16, 2

    params = init_params(kp, in_dim, int_dim, out_dim)
    x = jax.random.normal(kx, (N, in_dim, T, H, W), jnp.float32)

    fwd = jax.jit(functools.partial(bottleneck_forward, stride=stride))
    y = jax.block_until_ready(fwd(x, params))

    H_out = (H - 1) // stride + 1
    W_out = (W - 1) // stride + 1
    assert y.shape == (N, out_dim, T, H_out, W_out)
    assert y.dtype == jnp.float32
    assert bool(jnp.all(jnp.isfinite(y)))
    print("KERNEL_OK")
</pallas_src>

<mosaic_0001>
module attributes {stable_mosaic.version = 11 : i64} {
  func.func @_bottleneck_kernel(%arg0: i32, %arg1: memref<1x16x1024xf32, #tpu.memory_space<vmem>>, %arg2: memref<9x1024xf32, #tpu.memory_space<vmem>>, %arg3: memref<8x48xf32, #tpu.memory_space<vmem>>, %arg4: memref<8x1xf32, #tpu.memory_space<vmem>>, %arg5: memref<8x72xf32, #tpu.memory_space<vmem>>, %arg6: memref<8x1xf32, #tpu.memory_space<vmem>>, %arg7: memref<32x8xf32, #tpu.memory_space<vmem>>, %arg8: memref<32x16xf32, #tpu.memory_space<vmem>>, %arg9: memref<32x1xf32, #tpu.memory_space<vmem>>, %arg10: memref<1x32x1024xf32, #tpu.memory_space<vmem>>) attributes {dimension_semantics = [#tpu.dimension_semantics<parallel>], iteration_bounds = array<i64: 2>, scalar_prefetch = 0 : i64, scratch_operands = 0 : i64, tpu.core_type = #tpu.core_type<tc>, window_params = [{transform_indices = @transform_0, window_bounds = array<i64: 1, 16, 1024>}, {pipeline_mode = #tpu.pipeline_mode<synchronous>, transform_indices = @transform_1, window_bounds = array<i64: 9, 1024>}, {pipeline_mode = #tpu.pipeline_mode<synchronous>, transform_indices = @transform_2, window_bounds = array<i64: 8, 48>}, {pipeline_mode = #tpu.pipeline_mode<synchronous>, transform_indices = @transform_3, window_bounds = array<i64: 8, 1>}, {pipeline_mode = #tpu.pipeline_mode<synchronous>, transform_indices = @transform_4, window_bounds = array<i64: 8, 72>}, {pipeline_mode = #tpu.pipeline_mode<synchronous>, transform_indices = @transform_5, window_bounds = array<i64: 8, 1>}, {pipeline_mode = #tpu.pipeline_mode<synchronous>, transform_indices = @transform_6, window_bounds = array<i64: 32, 8>}, {pipeline_mode = #tpu.pipeline_mode<synchronous>, transform_indices = @transform_7, window_bounds = array<i64: 32, 16>}, {pipeline_mode = #tpu.pipeline_mode<synchronous>, transform_indices = @transform_8, window_bounds = array<i64: 32, 1>}, {transform_indices = @transform_9, window_bounds = array<i64: 1, 32, 1024>}]} {
    %c0 = arith.constant 0 : index
    %c0_0 = arith.constant 0 : index
    %c0_1 = arith.constant 0 : index
    %0 = vector.load %arg1[%c0, %c0_0, %c0_1] : memref<1x16x1024xf32, #tpu.memory_space<vmem>>, vector<1x16x1024xf32>
    %1 = vector.shape_cast %0 : vector<1x16x1024xf32> to vector<16x1024xf32>
    %cst = arith.constant 0.000000e+00 : f32
    %2 = vector.broadcast %cst : f32 to vector<16x256xf32>
    %3 = tpu.concatenate %2, %1, %2 in 1 : vector<16x256xf32>, vector<16x1024xf32>, vector<16x256xf32> -> vector<16x1536xf32>
    %4 = vector.extract_strided_slice %3 {offsets = [0, 0], sizes = [16, 1024], strides = [1, 1]} : vector<16x1536xf32> to vector<16x1024xf32>
    %5 = vector.extract_strided_slice %3 {offsets = [0, 512], sizes = [16, 1024], strides = [1, 1]} : vector<16x1536xf32> to vector<16x1024xf32>
    %6 = tpu.concatenate %4, %1, %5 in 0 : vector<16x1024xf32>, vector<16x1024xf32>, vector<16x1024xf32> -> vector<48x1024xf32>
    %c0_2 = arith.constant 0 : index
    %c0_3 = arith.constant 0 : index
    %7 = vector.load %arg3[%c0_2, %c0_3] : memref<8x48xf32, #tpu.memory_space<vmem>>, vector<8x48xf32>
    %cst_4 = arith.constant dense<0.000000e+00> : vector<8x1024xf32>
    %8 = tpu.matmul %7, %6, %cst_4 {dimension_numbers = #tpu.dot_dimension_numbers<[1], [0], [0], [1], [0, 0, 1, 1], [], []>} : vector<8x48xf32>, vector<48x1024xf32>, vector<8x1024xf32> -> vector<8x1024xf32>
    %c0_5 = arith.constant 0 : index
    %c0_6 = arith.constant 0 : index
    %9 = vector.load %arg4[%c0_5, %c0_6] : memref<8x1xf32, #tpu.memory_space<vmem>>, vector<8x1xf32>
    %10 = vector.broadcast %9 : vector<8x1xf32> to vector<8x1024xf32>
    %11 = arith.addf %8, %10 : vector<8x1024xf32>
    %cst_7 = arith.constant 0.000000e+00 : f32
    %12 = vector.broadcast %cst_7 : f32 to vector<8x1024xf32>
    %13 = arith.maximumf %11, %12 : vector<8x1024xf32>
    %cst_8 = arith.constant 0.000000e+00 : f32
    %14 = vector.broadcast %cst_8 : f32 to vector<8x128xf32>
    %15 = tpu.concatenate %14, %13, %14 in 1 : vector<8x128xf32>, vector<8x1024xf32>, vector<8x128xf32> -> vector<8x1280xf32>
    %16 = vector.extract_strided_slice %15 {offsets = [0, 111], sizes = [8, 1024], strides = [1, 1]} : vector<8x1280xf32> to vector<8x1024xf32>
    %c0_9 = arith.constant 0 : index
    %c0_10 = arith.constant 0 : index
    %17 = vector.load %arg2[%c0_9, %c0_10] : memref<9x1024xf32, #tpu.memory_space<vmem>>, vector<1x1024xf32>
    %18 = vector.broadcast %17 : vector<1x1024xf32> to vector<8x1024xf32>
    %19 = arith.mulf %16, %18 : vector<8x1024xf32>
    %20 = vector.extract_strided_slice %15 {offsets = [0, 112], sizes = [8, 1024], strides = [1, 1]} : vector<8x1280xf32> to vector<8x1024xf32>
    %c1 = arith.constant 1 : index
    %c0_11 = arith.constant 0 : index
    %21 = vector.load %arg2[%c1, %c0_11] : memref<9x1024xf32, #tpu.memory_space<vmem>>, vector<1x1024xf32>
    %22 = vector.broadcast %21 : vector<1x1024xf32> to vector<8x1024xf32>
    %23 = arith.mulf %20, %22 : vector<8x1024xf32>
    %24 = vector.extract_strided_slice %15 {offsets = [0, 113], sizes = [8, 1024], strides = [1, 1]} : vector<8x1280xf32> to vector<8x1024xf32>
    %c2 = arith.constant 2 : index
    %c0_12 = arith.constant 0 : index
    %25 = vector.load %arg2[%c2, %c0_12] : memref<9x1024xf32, #tpu.memory_space<vmem>>, vector<1x1024xf32>
    %26 = vector.broadcast %25 : vector<1x1024xf32> to vector<8x1024xf32>
    %27 = arith.mulf %24, %26 : vector<8x1024xf32>
    %28 = vector.extract_strided_slice %15 {offsets = [0, 127], sizes = [8, 1024], strides = [1, 1]} : vector<8x1280xf32> to vector<8x1024xf32>
    %c3 = arith.constant 3 : index
    %c0_13 = arith.constant 0 : index
    %29 = vector.load %arg2[%c3, %c0_13] : memref<9x1024xf32, #tpu.memory_space<vmem>>, vector<1x1024xf32>
    %30 = vector.broadcast %29 : vector<1x1024xf32> to vector<8x1024xf32>
    %31 = arith.mulf %28, %30 : vector<8x1024xf32>
    %32 = vector.extract_strided_slice %15 {offsets = [0, 129], sizes = [8, 1024], strides = [1, 1]} : vector<8x1280xf32> to vector<8x1024xf32>
    %c5 = arith.constant 5 : index
    %c0_14 = arith.constant 0 : index
    %33 = vector.load %arg2[%c5, %c0_14] : memref<9x1024xf32, #tpu.memory_space<vmem>>, vector<1x1024xf32>
    %34 = vector.broadcast %33 : vector<1x1024xf32> to vector<8x1024xf32>
    %35 = arith.mulf %32, %34 : vector<8x1024xf32>
    %36 = vector.extract_strided_slice %15 {offsets = [0, 143], sizes = [8, 1024], strides = [1, 1]} : vector<8x1280xf32> to vector<8x1024xf32>
    %c6 = arith.constant 6 : index
    %c0_15 = arith.constant 0 : index
    %37 = vector.load %arg2[%c6, %c0_15] : memref<9x1024xf32, #tpu.memory_space<vmem>>, vector<1x1024xf32>
    %38 = vector.broadcast %37 : vector<1x1024xf32> to vector<8x1024xf32>
    %39 = arith.mulf %36, %38 : vector<8x1024xf32>
    %40 = vector.extract_strided_slice %15 {offsets = [0, 144], sizes = [8, 1024], strides = [1, 1]} : vector<8x1280xf32> to vector<8x1024xf32>
    %c7 = arith.constant 7 : index
    %c0_16 = arith.constant 0 : index
    %41 = vector.load %arg2[%c7, %c0_16] : memref<9x1024xf32, #tpu.memory_space<vmem>>, vector<1x1024xf32>
    %42 = vector.broadcast %41 : vector<1x1024xf32> to vector<8x1024xf32>
    %43 = arith.mulf %40, %42 : vector<8x1024xf32>
    %44 = vector.extract_strided_slice %15 {offsets = [0, 145], sizes = [8, 1024], strides = [1, 1]} : vector<8x1280xf32> to vector<8x1024xf32>
    %c8 = arith.constant 8 : index
    %c0_17 = arith.constant 0 : index
    %45 = vector.load %arg2[%c8, %c0_17] : memref<9x1024xf32, #tpu.memory_space<vmem>>, vector<1x1024xf32>
    %46 = vector.broadcast %45 : vector<1x1024xf32> to vector<8x1024xf32>
    %47 = arith.mulf %44, %46 : vector<8x1024xf32>
    %48 = tpu.concatenate %19, %23, %27, %31, %13, %35, %39, %43, %47 in 0 : vector<8x1024xf32>, vector<8x1024xf32>, vector<8x1024xf32>, vector<8x1024xf32>, vector<8x1024xf32>, vector<8x1024xf32>, vector<8x1024xf32>, vector<8x1024xf32>, vector<8x1024xf32> -> vector<72x1024xf32>
    %c0_18 = arith.constant 0 : index
    %c0_19 = arith.constant 0 : index
    %49 = vector.load %arg5[%c0_18, %c0_19] : memref<8x72xf32, #tpu.memory_space<vmem>>, vector<8x72xf32>
    %cst_20 = arith.constant dense<0.000000e+00> : vector<8x1024xf32>
    %50 = tpu.matmul %49, %48, %cst_20 {dimension_numbers = #tpu.dot_dimension_numbers<[1], [0], [0], [1], [0, 0, 1, 1], [], []>} : vector<8x72xf32>, vector<72x1024xf32>, vector<8x1024xf32> -> vector<8x1024xf32>
    %c0_21 = arith.constant 0 : index
    %c0_22 = arith.constant 0 : index
    %51 = vector.load %arg6[%c0_21, %c0_22] : memref<8x1xf32, #tpu.memory_space<vmem>>, vector<8x1xf32>
    %52 = vector.broadcast %51 : vector<8x1xf32> to vector<8x1024xf32>
    %53 = arith.addf %50, %52 : vector<8x1024xf32>
    %cst_23 = arith.constant 0.000000e+00 : f32
    %54 = vector.broadcast %cst_23 : f32 to vector<8x1024xf32>
    %55 = arith.maximumf %53, %54 : vector<8x1024xf32>
    %c0_24 = arith.constant 0 : index
    %c0_25 = arith.constant 0 : index
    %56 = vector.load %arg7[%c0_24, %c0_25] : memref<32x8xf32, #tpu.memory_space<vmem>>, vector<32x8xf32>
    %cst_26 = arith.constant dense<0.000000e+00> : vector<32x1024xf32>
    %57 = tpu.matmul %56, %55, %cst_26 {dimension_numbers = #tpu.dot_dimension_numbers<[1], [0], [0], [1], [0, 0, 1, 1], [], []>} : vector<32x8xf32>, vector<8x1024xf32>, vector<32x1024xf32> -> vector<32x1024xf32>
    %c0_27 = arith.constant 0 : index
    %c0_28 = arith.constant 0 : index
    %58 = vector.load %arg8[%c0_27, %c0_28] : memref<32x16xf32, #tpu.memory_space<vmem>>, vector<32x16xf32>
    %cst_29 = arith.constant dense<0.000000e+00> : vector<32x1024xf32>
    %59 = tpu.matmul %58, %1, %cst_29 {dimension_numbers = #tpu.dot_dimension_numbers<[1], [0], [0], [1], [0, 0, 1, 1], [], []>} : vector<32x16xf32>, vector<16x1024xf32>, vector<32x1024xf32> -> vector<32x1024xf32>
    %60 = arith.addf %57, %59 : vector<32x1024xf32>
    %c0_30 = arith.constant 0 : index
    %c0_31 = arith.constant 0 : index
    %61 = vector.load %arg9[%c0_30, %c0_31] : memref<32x1xf32, #tpu.memory_space<vmem>>, vector<32x1xf32>
    %62 = vector.broadcast %61 : vector<32x1xf32> to vector<32x1024xf32>
    %63 = arith.addf %60, %62 : vector<32x1024xf32>
    %cst_32 = arith.constant 0.000000e+00 : f32
    %64 = vector.broadcast %cst_32 : f32 to vector<32x1024xf32>
    %65 = arith.maximumf %63, %64 : vector<32x1024xf32>
    %c0_33 = arith.constant 0 : index
    %c0_34 = arith.constant 0 : index
    %c0_35 = arith.constant 0 : index
    %66 = vector.load %arg10[%c0_33, %c0_34, %c0_35] : memref<1x32x1024xf32, #tpu.memory_space<vmem>>, vector<1x32x1024xf32>
    %67 = vector.shape_cast %66 : vector<1x32x1024xf32> to vector<32x1024xf32>
    %68 = vector.shape_cast %65 : vector<32x1024xf32> to vector<1x32x1024xf32>
    tpu.vector_store %arg10[%c0_33, %c0_34, %c0_35], %68 {strides = array<i32>} : memref<1x32x1024xf32, #tpu.memory_space<vmem>>, vector<1x32x1024xf32>,
    return
  }
  func.func @transform_0(%arg0: i32) -> (i32, i32, i32) {
    %c0_i32 = arith.constant 0 : i32
    %c0_i32_0 = arith.constant 0 : i32
    %c0_i32_1 = arith.constant 0 : i32
    return %arg0, %c0_i32, %c0_i32_0 : i32, i32, i32
  }
  func.func @transform_1(%arg0: i32) -> (i32, i32) {
    %c0_i32 = arith.constant 0 : i32
    %c0_i32_0 = arith.constant 0 : i32
    %c0_i32_1 = arith.constant 0 : i32
    return %c0_i32, %c0_i32_0 : i32, i32
  }
  func.func @transform_2(%arg0: i32) -> (i32, i32) {
    %c0_i32 = arith.constant 0 : i32
    %c0_i32_0 = arith.constant 0 : i32
    %c0_i32_1 = arith.constant 0 : i32
    return %c0_i32, %c0_i32_0 : i32, i32
  }
  func.func @transform_3(%arg0: i32) -> (i32, i32) {
    %c0_i32 = arith.constant 0 : i32
    %c0_i32_0 = arith.constant 0 : i32
    %c0_i32_1 = arith.constant 0 : i32
    return %c0_i32, %c0_i32_0 : i32, i32
  }
  func.func @transform_4(%arg0: i32) -> (i32, i32) {
    %c0_i32 = arith.constant 0 : i32
    %c0_i32_0 = arith.constant 0 : i32
    %c0_i32_1 = arith.constant 0 : i32
    return %c0_i32, %c0_i32_0 : i32, i32
  }
  func.func @transform_5(%arg0: i32) -> (i32, i32) {
    %c0_i32 = arith.constant 0 : i32
    %c0_i32_0 = arith.constant 0 : i32
    %c0_i32_1 = arith.constant 0 : i32
    return %c0_i32, %c0_i32_0 : i32, i32
  }
  func.func @transform_6(%arg0: i32) -> (i32, i32) {
    %c0_i32 = arith.constant 0 : i32
    %c0_i32_0 = arith.constant 0 : i32
    %c0_i32_1 = arith.constant 0 : i32
    return %c0_i32, %c0_i32_0 : i32, i32
  }
  func.func @transform_7(%arg0: i32) -> (i32, i32) {
    %c0_i32 = arith.constant 0 : i32
    %c0_i32_0 = arith.constant 0 : i32
    %c0_i32_1 = arith.constant 0 : i32
    return %c0_i32, %c0_i32_0 : i32, i32
  }
  func.func @transform_8(%arg0: i32) -> (i32, i32) {
    %c0_i32 = arith.constant 0 : i32
    %c0_i32_0 = arith.constant 0 : i32
    %c0_i32_1 = arith.constant 0 : i32
    return %c0_i32, %c0_i32_0 : i32, i32
  }
  func.func @transform_9(%arg0: i32) -> (i32, i32, i32) {
    %c0_i32 = arith.constant 0 : i32
    %c0_i32_0 = arith.constant 0 : i32
    %c0_i32_1 = arith.constant 0 : i32
    return %arg0, %c0_i32, %c0_i32_0 : i32, i32, i32
  }
}

</mosaic_0001>

<bundles_post_ra>
// kernel: bottleneck_forward.1
= control target key start
LH: loop header
LB: loop body
LE: loop exit
PB: predicated region body
PF: predicated region fallthrough
CT: control target
= control target key end

     0   :  { %s2996_s30 = smov 0   ;;  %s4555_s0 = inlined_call_operand.vmem [shape: f32[2,16,1024], index: 0, kind: input, shape index: {}]   ;;  %s4556_s1 = inlined_call_operand.vmem [shape: f32[9,1024], index: 1, kind: input, shape index: {}]   ;;  %s4557_s2 = inlined_call_operand.vmem [shape: f32[8,48], index: 2, kind: input, shape index: {}]   ;;  %s4558_s3 = inlined_call_operand.vmem [shape: f32[8,1], index: 3, kind: input, shape index: {}]   ;;  %s4559_s4 = inlined_call_operand.vmem [shape: f32[8,72], index: 4, kind: input, shape index: {}]   ;;  %s4560_s5 = inlined_call_operand.vmem [shape: f32[8,1], index: 5, kind: input, shape index: {}]   ;;  %s4561_s6 = inlined_call_operand.vmem [shape: f32[32,8], index: 6, kind: input, shape index: {}]   ;;  %s4562_s7 = inlined_call_operand.vmem [shape: f32[32,16], index: 7, kind: input, shape index: {}]   ;;  %s4563_s8 = inlined_call_operand.vmem [shape: f32[32,1], index: 8, kind: input, shape index: {}]   ;;  %s4564_s9 = inlined_call_operand.vmem [shape: f32[2,32,1024], index: 9, kind: output, shape index: {}]  }
   0x1 LB: > { %s2414_s10 = sadd.s32 4294967295, %s2929_s30   ;;  %p2418_p0 = scmp.ge.s32.totalorder %s2929_s30, 1  ;;  %s2929_s30 = sphi %s2996_s30, %s19_s30  }
   0x2   : > { %p287_p1 = scmp.lt.s32.totalorder %s2929_s30, 3 }
   0x4   : > { %p288_p2 = pnand %p2418_p0, %p287_p1 }
   0x5   : > { %p323_p3 = scmp.lt.s32.totalorder (!%p288_p2), %s2414_s10, 1  ;;  %s2932_s18 = smov (!%p288_p2), 111  }
   0x6   : > { %291 = sbr.rel (%p288_p2) target bundleno = 984 (0x3d8), region = 56  ;;  %s2934_s28 = smov (!%p288_p2), 112  }
   0x7   : > { %s2935_s14 = smov (!%p288_p2), 113   ;;  %s2936_s20 = smov (!%p288_p2), 127  }
   0x8   : > { %s2937_s26 = smov (!%p288_p2), 1   ;;  %s2938_s13 = smov (!%p288_p2), 15  }
   0x9   : > { %s2939_s19 = smov (!%p288_p2), 16   ;;  %s2941_s27 = smov (!%p288_p2), 126  }
   0xa   : > { %s2943_s29 = smov (!%p288_p2), 96   ;;  %s2944_s11 = smov (!%p288_p2), 94  }
   0xb   : > { %v350_v0 = vld [vmem:[%s4558_s3] sm:$0xff]  ;;  %v2931_v2 = vmov 0   ;;  %s4592_s10 = smov (!%p323_p3, %s2414_s10), 1  ;;  %v2933_v22 = vmov 0.0   ;;  %vm356_vm0 = vcmask 392192   ;;  %vm556_vm1 = vcmask 908288  }
   0xc   : > { %v528_v1 = vld [vmem:[%s4556_s1] ss:$8 sm:$0xf]  ;;  %2544 = vset.pattern.permute.xlu0 %v2931_v2  ;;  %2905 = vset.pattern.permute.xlu1 %v2931_v2  ;;  %s2519_s17 = sshll.u32 %s4592_s10, 7  ;;  %vm611_vm2 = vcmask 916480   ;;  %vm666_vm3 = vcmask 924672  }
   0xd   : > { %v529_v3 = vld [vmem:[%s4556_s1] ss:$8 sm:$0xf0]  ;;  %353 = vperm.xlu0 %2544, %v350_v0   ;;  %2906 = vset.pattern.permute.xlu2 %v2931_v2  ;;  %s3025_s21 = scalar_lea.vmem %s4555_s0, %s2519_s17  ;;  %v2431_v27 = vld [vmem:[%s4556_s1 + $0x1] ss:$8 sm:$0xf] }
   0xe   : > { %v3013_v4 = vor.u32 %v529_v3, %v528_v1  ;;  %v3028_v7 = vld [vmem:[%s3025_s21 + $0x50] sm:$0xff]  ;;  %v3031_v8 = vld [vmem:[%s3025_s21 + $0x58] sm:$0xff]  ;;  %v3034_v9 = vld [vmem:[%s3025_s21 + $0x60] sm:$0xff]  ;;  %vm721_vm4 = vcmask 1039360   ;;  %vm776_vm5 = vcmask 7168   ;;  %vm831_vm6 = vcmask 121856  }
   0xf   : > { %370 = vmatpush.msra.mxu0 %v3028_v7  ;;  %390 = vmatpush.msra.mxu1 %v3031_v8  ;;  %v3039_v10 = vld [vmem:[%s3025_s21 + $0x68] sm:$0xff]  ;;  %v3042_v11 = vld [vmem:[%s3025_s21 + $0x10] sm:$0xff]  ;;  %v3045_v12 = vld [vmem:[%s3025_s21 + $0x18] sm:$0xff]  ;;  %vm886_vm7 = vcmask 130048   ;;  %vm941_vm8 = vcmask 138240   ;;  %s2945_s12 = smov 110  }
  0x10   : > { %v535_v5 = vperm.slane %v3013_v4, 3  ;;  %v533_v6 = vperm.slane %v3013_v4, 1  ;;  %v532_v13 = vperm.slane %v3013_v4, 0  ;;  %410 = vmatpush.msra.mxu2 %v3034_v9  ;;  %430 = vmatpush.msra.mxu3 %v3039_v10  ;;  %v3051_v14 = vld [vmem:[%s3025_s21 + $0x20] sm:$0xff]  ;;  %v3054_v15 = vld [vmem:[%s3025_s21 + $0x28] sm:$0xff]  ;;  %v536_v18 = vperm.slane %v3013_v4, 4 }
  0x11   : > { %v341_v16 = vld [vmem:[%s3025_s21 + $0x40] sm:$0xff]  ;;  %371 = vmatpush.msra.mxu0 %v3042_v11  ;;  %391 = vmatpush.msra.mxu1 %v3045_v12  ;;  %v342_v17 = vld [vmem:[%s3025_s21 + $0x48] sm:$0xff]  ;;  %v534_v19 = vperm.slane %v3013_v4, 2  ;;  %v537_v23 = vperm.slane %v3013_v4, 5  ;;  %v347_v25 = vld [vmem:[%s3025_s21 + $0x70] sm:$0xff]  ;;  %v539_v31 = vperm.slane %v3013_v4, 7 }
  0x12   : > { %546 = vrot.lane.b32.xlu2 %v535_v5, %s2932_s18  ;;  %542 = vrot.lane.b32.xlu1 %v533_v6, %s2932_s18  ;;  %v333_v20 = vld [vmem:[%s3025_s21] sm:$0xff]  ;;  %v334_v21 = vld [vmem:[%s3025_s21 + $0x8] sm:$0xff]  ;;  %v538_v32 = vperm.slane %v3013_v4, 6  ;;  %vm1029_vm9 = vcmask 1031168   ;;  %vm1167_vm10 = vcmask 785408   ;;  %vm1239_vm11 = vcmask 769024  }
  0x13   : > { %411 = vmatpush.msra.mxu2 %v3051_v14  ;;  %431 = vmatpush.msra.mxu3 %v3054_v15  ;;  %v349_v24 = vld [vmem:[%s4557_s2] sm:$0xff]  ;;  %v348_v26 = vld [vmem:[%s3025_s21 + $0x78] sm:$0xff]  ;;  %v339_v29 = vld [vmem:[%s3025_s21 + $0x30] sm:$0xff]  ;;  %vm1203_vm12 = vcmask 777216   ;;  %vm1131_vm13 = vcmask 900096   ;;  %vm1570_vm14 = vcmask 588800  }
  0x14   : > { %372 = vmatpush.msra.mxu0 %v341_v16  ;;  %392 = vmatpush.msra.mxu1 %v342_v17  ;;  %v2432_v28 = vld [vmem:[%s4556_s1 + $0x1] ss:$8 sm:$0xf0]  ;;  %v2433_v40 = vld [vmem:[%s4556_s1 + $0x2] ss:$8 sm:$0xf] }
  0x15   : > { %540 = vrot.lane.b32.xlu0 %v532_v13, %s2932_s18  ;;  %412 = vmatpush.msra.mxu2 %v3028_v7  ;;  %v340_v30 = vld [vmem:[%s3025_s21 + $0x38] sm:$0xff]  ;;  %v585_v33 = vor.u32 %v2432_v28, %v2431_v27  ;;  %vm1994_vm15 = vcmask 64512   ;;  %s2520_s23 = sshll.u32 %s4592_s10, 8 }
  0x16   : > { %432 = vmatpush.msra.mxu3 %v3031_v8  ;;  %373 = vmatpush.msra.mxu0 %v333_v20  ;;  %v2434_v41 = vld [vmem:[%s4556_s1 + $0x2] ss:$8 sm:$0xf0]  ;;  %v2435_v52 = vld [vmem:[%s4556_s1 + $0x3] ss:$8 sm:$0xf] }
  0x17   : > { %393 = vmatpush.msra.mxu1 %v334_v21  ;;  %413 = vmatpush.msra.mxu2 %v3042_v11  ;;  %v587_v34 = vperm.slane %v585_v33, 0  ;;  %v589_v35 = vperm.slane %v585_v33, 2  ;;  %v588_v36 = vperm.slane %v585_v33, 1  ;;  %v590_v37 = vperm.slane %v585_v33, 3 }
  0x18   : > { %433 = vmatpush.msra.mxu3 %v3045_v12  ;;  %374 = vmatpush.msra.mxu0 %v2933_v22  ;;  %v592_v38 = vperm.slane %v585_v33, 5  ;;  %v591_v39 = vperm.slane %v585_v33, 4  ;;  %v640_v42 = vor.u32 %v2434_v41, %v2433_v40  ;;  %v593_v43 = vperm.slane %v585_v33, 6  ;;  %v2436_v53 = vld [vmem:[%s4556_s1 + $0x3] ss:$8 sm:$0xf0] }
  0x19   : > { %394 = vmatpush.msra.mxu1 %v2933_v22  ;;  %414 = vmatpush.msra.mxu2 %v341_v16  ;;  %v594_v45 = vperm.slane %v585_v33, 7  ;;  %v695_v54 = vor.u32 %v2436_v53, %v2435_v52  ;;  %v2437_v62 = vld [vmem:[%s4556_s1 + $0x5] ss:$8 sm:$0xf] }
  0x1a   : > { %548 = vrot.lane.b32.xlu2 %v536_v18, %s2932_s18  ;;  %544 = vrot.lane.b32.xlu1 %v534_v19, %s2932_s18  ;;  %v642_v44 = vperm.slane %v640_v42, 0  ;;  %v643_v46 = vperm.slane %v640_v42, 1  ;;  %v645_v47 = vperm.slane %v640_v42, 3  ;;  %v644_v48 = vperm.slane %v640_v42, 2 }
  0x1b   : > { %434 = vmatpush.msra.mxu3 %v342_v17  ;;  %375 = vmatpush.msra.mxu0 %v2933_v22  ;;  %v646_v49 = vperm.slane %v640_v42, 4  ;;  %v648_v50 = vperm.slane %v640_v42, 6  ;;  %v647_v51 = vperm.slane %v640_v42, 5  ;;  %v649_v55 = vperm.slane %v640_v42, 7 }
  0x1c   : > { %395 = vmatpush.msra.mxu1 %v2933_v22  ;;  %415 = vmatpush.msra.mxu2 %v333_v20  ;;  %v698_v56 = vperm.slane %v695_v54, 1  ;;  %v697_v57 = vperm.slane %v695_v54, 0  ;;  %v699_v58 = vperm.slane %v695_v54, 2  ;;  %v701_v59 = vperm.slane %v695_v54, 4 }
  0x1d   : > { %435 = vmatpush.msra.mxu3 %v334_v21  ;;  %550 = vrot.lane.b32.xlu0 %v537_v23, %s2932_s18  ;;  %v700_v60 = vperm.slane %v695_v54, 3  ;;  %v702_v61 = vperm.slane %v695_v54, 5  ;;  %v2438_v63 = vld [vmem:[%s4556_s1 + $0x5] ss:$8 sm:$0xf0]  ;;  %v704_v0 = vperm.slane %v695_v54, 7 }
  0x1e   : > { %2423 = vmatmul.msk.f32.vlgmr.msra.gmra.mxu0 %vm356_vm0, %v349_v24  ;;  %2424 = vmatmul.msk.f32.vlgmr.msra.gmra.mxu1 %vm356_vm0, %v349_v24  ;;  %v703_v1 = vperm.slane %v695_v54, 6  ;;  %v750_v2 = vor.u32 %v2438_v63, %v2437_v62  ;;  %v2441_v28 = vld [vmem:[%s4556_s1 + $0x7] ss:$8 sm:$0xf] }
  0x1f   : > { %2425 = vmatmul.msk.f32.vlgmr.msra.gmra.mxu2 %vm356_vm0, %v349_v24  ;;  %2426 = vmatmul.msk.f32.vlgmr.msra.gmra.mxu3 %vm356_vm0, %v349_v24 }
  0x20   : > { %450 = vmatpush.msrb.mxu0 %v347_v25  ;;  %470 = vmatpush.msrb.mxu1 %v348_v26  ;;  %v752_v3 = vperm.slane %v750_v2, 0  ;;  %v754_v4 = vperm.slane %v750_v2, 2  ;;  %v753_v5 = vperm.slane %v750_v2, 1  ;;  %v759_v16 = vperm.slane %v750_v2, 7 }
  0x21   : > { %492 = vmatpush.msrb.mxu2 %v347_v25  ;;  %512 = vmatpush.msrb.mxu3 %v348_v26 }
  0x22   : > { %451 = vmatpush.msrb.mxu0 %v339_v29  ;;  %471 = vmatpush.msrb.mxu1 %v340_v30 }
  0x23   : > { %554 = vrot.lane.b32.xlu2 %v539_v31, %s2932_s18  ;;  %552 = vrot.lane.b32.xlu1 %v538_v32, %s2932_s18 }
  0x24   : > { %493 = vmatpush.msrb.mxu2 %v339_v29  ;;  %513 = vmatpush.msrb.mxu3 %v340_v30  ;;  %v2442_v29 = vld [vmem:[%s4556_s1 + $0x7] ss:$8 sm:$0xf0] }
  0x25   : > { %452 = vmatpush.msrb.mxu0 %v3034_v9  ;;  %472 = vmatpush.msrb.mxu1 %v3039_v10  ;;  %v860_v31 = vor.u32 %v2442_v29, %v2441_v28 }
  0x26   : > { %494 = vmatpush.msrb.mxu2 %v3034_v9  ;;  %514 = vmatpush.msrb.mxu3 %v3039_v10  ;;  %v756_v9 = vperm.slane %v750_v2, 4  ;;  %v2439_v10 = vld [vmem:[%s4556_s1 + $0x6] ss:$8 sm:$0xf] }
  0x27   : > { %453 = vmatpush.msrb.mxu0 %v3051_v14  ;;  %473 = vmatpush.msrb.mxu1 %v3054_v15  ;;  %v868_v52 = vperm.slane %v860_v31, 6 }
  0x28   : > { %495 = vmatpush.msrb.mxu2 %v3051_v14  ;;  %515 = vmatpush.msrb.mxu3 %v3054_v15  ;;  %v758_v14 = vperm.slane %v750_v2, 6 }
  0x29   : > { %595 = vrot.lane.b32.xlu0 %v587_v34, %s2934_s28  ;;  %454 = vmatpush.msrb.mxu0 %v3028_v7  ;;  %v755_v7 = vperm.slane %v750_v2, 3 }
  0x2a   : > { %474 = vmatpush.msrb.mxu1 %v3031_v8  ;;  %2429 = vmatmul.msk.f32.vlgmr.msrb.gmra.mxu2 %vm356_vm0, %v349_v24  ;;  %v757_v8 = vperm.slane %v750_v2, 5 }
  0x2b   : > { %2430 = vmatmul.msk.f32.vlgmr.msrb.gmra.mxu3 %vm356_vm0, %v349_v24  ;;  %455 = vmatpush.msrb.mxu0 %v3042_v11  ;;  %v2440_v11 = vld [vmem:[%s4556_s1 + $0x6] ss:$8 sm:$0xf0] }
  0x2c   : > { %475 = vmatpush.msrb.mxu1 %v3045_v12  ;;  %599 = vrot.lane.b32.xlu2 %v589_v35, %s2934_s28  ;;  %v805_v13 = vor.u32 %v2440_v11, %v2439_v10 }
  0x2d   : > { %597 = vrot.lane.b32.xlu1 %v588_v36, %s2934_s28  ;;  %2427 = vmatmul.msk.f32.vlgmr.msrb.gmra.mxu0 %vm356_vm0, %v349_v24  ;;  %v863_v36 = vperm.slane %v860_v31, 1 }
  0x2e   : > { %2428 = vmatmul.msk.f32.vlgmr.msrb.gmra.mxu1 %vm356_vm0, %v349_v24  ;;  %v807_v15 = vperm.slane %v805_v13, 0  ;;  %v808_v19 = vperm.slane %v805_v13, 1  ;;  %v810_v20 = vperm.slane %v805_v13, 3  ;;  %v809_v21 = vperm.slane %v805_v13, 2 }
  0x2f   : > { %v811_v23 = vperm.slane %v805_v13, 4  ;;  %v813_v26 = vperm.slane %v805_v13, 6  ;;  %v812_v27 = vperm.slane %v805_v13, 5  ;;  %v814_v32 = vperm.slane %v805_v13, 7 }
  0x31   : > { %601 = vrot.lane.b32.xlu0 %v590_v37, %s2934_s28  ;;  %v862_v37 = vperm.slane %v860_v31, 0 }
  0x34   : > { %605 = vrot.lane.b32.xlu2 %v592_v38, %s2934_s28 }
  0x35   : > { %603 = vrot.lane.b32.xlu1 %v591_v39, %s2934_s28  ;;  %v864_v39 = vperm.slane %v860_v31, 2 }
  0x39   : > { %607 = vrot.lane.b32.xlu0 %v593_v43, %s2934_s28  ;;  %v866_v43 = vperm.slane %v860_v31, 4 }
  0x3c   : > { %650 = vrot.lane.b32.xlu2 %v642_v44, %s2935_s14  ;;  %v865_v44 = vperm.slane %v860_v31, 3 }
  0x3d   : > { %609 = vrot.lane.b32.xlu1 %v594_v45, %s2934_s28 }
  0x41   : > { %652 = vrot.lane.b32.xlu0 %v643_v46, %s2935_s14  ;;  %v867_v46 = vperm.slane %v860_v31, 5 }
  0x44   : > { %656 = vrot.lane.b32.xlu2 %v645_v47, %s2935_s14 }
  0x45   : > { %654 = vrot.lane.b32.xlu1 %v644_v48, %s2935_s14  ;;  %v2443_v48 = vld [vmem:[%s4556_s1 + $0x40] ss:$8 sm:$0xf] }
  0x49   : > { %658 = vrot.lane.b32.xlu0 %v646_v49, %s2935_s14  ;;  %v2444_v49 = vld [vmem:[%s4556_s1 + $0x40] ss:$8 sm:$0xf0] }
  0x4a   : > { %v3197_v53 = vor.u32 %v2444_v49, %v2443_v48 }
  0x4c   : > { %662 = vrot.lane.b32.xlu2 %v648_v50, %s2935_s14 }
  0x4d   : > { %660 = vrot.lane.b32.xlu1 %v647_v51, %s2935_s14  ;;  %v869_v51 = vperm.slane %v860_v31, 7 }
  0x51   : > { %664 = vrot.lane.b32.xlu0 %v649_v55, %s2935_s14  ;;  %v917_v55 = vperm.slane %v3197_v53, 0 }
  0x54   : > { %707 = vrot.lane.b32.xlu2 %v698_v56, %s2936_s20 }
  0x55   : > { %705 = vrot.lane.b32.xlu1 %v697_v57, %s2936_s20 }
  0x59   : > { %709 = vrot.lane.b32.xlu0 %v699_v58, %s2936_s20  ;;  %v919_v58 = vperm.slane %v3197_v53, 2 }
  0x5c   : > { %713 = vrot.lane.b32.xlu2 %v701_v59, %s2936_s20 }
  0x5d   : > { %711 = vrot.lane.b32.xlu1 %v700_v60, %s2936_s20  ;;  %v918_v60 = vperm.slane %v3197_v53, 1 }
  0x61   : > { %715 = vrot.lane.b32.xlu0 %v702_v61, %s2936_s20 }
  0x64   : > { %719 = vrot.lane.b32.xlu2 %v704_v0, %s2936_s20  ;;  %v920_v0 = vperm.slane %v3197_v53, 3 }
  0x65   : > { %717 = vrot.lane.b32.xlu1 %v703_v1, %s2936_s20 }
  0x69   : > { %760 = vrot.lane.b32.xlu0 %v752_v3, %s2937_s26 }
  0x6c   : > { %v3146_v6 = vpop.permute.xlu2 %546  ;;  %764 = vrot.lane.b32.xlu2 %v754_v4, %s2937_s26  ;;  %v922_v4 = vperm.slane %v3197_v53, 5 }
  0x6d   : > { %762 = vrot.lane.b32.xlu1 %v753_v5, %s2937_s26  ;;  %v921_v5 = vperm.slane %v3197_v53, 4 }
  0x71   : > { %766 = vrot.lane.b32.xlu0 %v755_v7, %s2937_s26 }
  0x74   : > { %v3154_v12 = vpop.permute.xlu2 %548  ;;  %770 = vrot.lane.b32.xlu2 %v757_v8, %s2937_s26 }
  0x75   : > { %768 = vrot.lane.b32.xlu1 %v756_v9, %s2937_s26 }
  0x79   : > { %772 = vrot.lane.b32.xlu0 %v758_v14, %s2937_s26 }
  0x7c   : > { %815 = vrot.lane.b32.xlu2 %v807_v15, %s2938_s13 }
  0x7d   : > { %774 = vrot.lane.b32.xlu1 %v759_v16, %s2937_s26  ;;  %v3158_v18 = vpop.permute.xlu2 %554  ;;  %s2940_s26 = smov 17  }
  0x7f   : > { %v3156_v17 = vpop.permute.xlu0 %353 }
  0x81   : > { %817 = vrot.lane.b32.xlu0 %v808_v19, %s2938_s13  ;;  %v923_v19 = vperm.slane %v3197_v53, 6 }
  0x84   : > { %v3160_v22 = vpop.permute.xlu1 %542  ;;  %821 = vrot.lane.b32.xlu2 %v810_v20, %s2938_s13 }
  0x85   : > { %819 = vrot.lane.b32.xlu1 %v809_v21, %s2938_s13 }
  0x86   : > { %v3162_v24 = vpop.permute.xlu2 %599 }
  0x87   : > { %v3164_v25 = vpop.permute.xlu0 %540 }
  0x89   : > { %823 = vrot.lane.b32.xlu0 %v811_v23, %s2938_s13 }
  0x8c   : > { %v3172_v30 = vpop.permute.xlu1 %544  ;;  %827 = vrot.lane.b32.xlu2 %v813_v26, %s2938_s13 }
  0x8d   : > { %825 = vrot.lane.b32.xlu1 %v812_v27, %s2938_s13 }
  0x8e   : > { %v3174_v33 = vpop.permute.xlu2 %605 }
  0x8f   : > { %v551_v34 = vpop.permute.xlu0 %550 }
  0x90   : > { %v3178_v35 = vsel %vm556_vm1, %v3154_v12, %v551_v34 }
  0x91   : > { %829 = vrot.lane.b32.xlu0 %v814_v32, %s2938_s13 }
  0x94   : > { %872 = vrot.lane.b32.xlu2 %v863_v36, %s2939_s19 }
  0x95   : > { %870 = vrot.lane.b32.xlu1 %v862_v37, %s2939_s19  ;;  %v553_v38 = vpop.permute.xlu1 %552  ;;  %v924_v37 = vperm.slane %v3197_v53, 7 }
  0x96   : > { %v3180_v40 = vpop.permute.xlu2 %650  ;;  %v3183_v41 = vsel %vm556_vm1, %v551_v34, %v553_v38  ;;  %v3187_v42 = vsel %vm556_vm1, %v553_v38, %v3158_v18 }
  0x99   : > { %874 = vrot.lane.b32.xlu0 %v864_v39, %s2939_s19 }
  0x9b   : > { %v596_v45 = vpop.permute.xlu0 %595  ;;  %v377_v61 = vpop.f32.mrf.mxu0 }
  0x9c   : > { %878 = vrot.lane.b32.xlu2 %v866_v43, %s2939_s19  ;;  %v397_v63 = vpop.f32.mrf.mxu1  ;;  %v378_v1 = vadd.f32 %v377_v61, %v3156_v17  ;;  %v628_v29 = vmul.f32 0.0, %v596_v45 }
  0x9d   : > { %876 = vrot.lane.b32.xlu1 %v865_v44, %s2939_s19  ;;  %v398_v15 = vadd.f32 %v397_v63, %v3156_v17 }
  0x9e   : > { %v3189_v47 = vpop.permute.xlu2 %656  ;;  %v3218_v7 = vmax.f32 %v378_v1, 0.0 }
  0x9f   : > { %v598_v50 = vpop.permute.xlu1 %597  ;;  %v3237_v34 = vmax.f32 %v398_v15, 0.0 }
  0xa0   : > { %v612_v14 = vsel %vm611_vm2, %v596_v45, %v598_v50  ;;  %v613_v48 = vsel %vm611_vm2, %v598_v50, %v3162_v24 }
  0xa1   : > { %880 = vrot.lane.b32.xlu0 %v867_v46, %s2939_s19  ;;  %v629_v23 = vmul.f32 %v612_v14, %v3218_v7 }
  0xa2   : > { %v417_v59 = vpop.f32.mrf.mxu2  ;;  %v437_v8 = vpop.f32.mrf.mxu3 }
  0xa3   : > { %v3199_v54 = vpop.permute.xlu0 %601  ;;  %v418_v9 = vadd.f32 %v417_v59, %v3156_v17  ;;  %v438_v36 = vadd.f32 %v437_v8, %v3156_v17  ;;  %v2545_v39 = vpack.i.bf16 %v629_v23, %v628_v29 }
  0xa4   : > { %884 = vrot.lane.b32.xlu2 %v869_v51, %s2939_s19  ;;  %v614_v31 = vsel %vm611_vm2, %v3162_v24, %v3199_v54 }
  0xa5   : > { %882 = vrot.lane.b32.xlu1 %v868_v52, %s2939_s19  ;;  %v3230_v26 = vmax.f32 %v418_v9, 0.0  ;;  %v3254_v52 = vmax.f32 %v438_v36, 0.0 }
  0xa6   : > { %v3202_v56 = vpop.permute.xlu2 %662 }
  0xa7   : > { %v604_v57 = vpop.permute.xlu1 %603  ;;  %v631_v46 = vmul.f32 %v614_v31, %v3230_v26 }
  0xa8   : > { %v616_v24 = vsel %vm611_vm2, %v604_v57, %v3174_v33 }
  0xa9   : > { %925 = vrot.lane.b32.xlu0 %v917_v55, %s2940_s26  ;;  %v630_v55 = vmul.f32 %v613_v48, %v3237_v34 }
  0xaa   : > { %v457_v13 = vpop.f32.mrf.mxu0 }
  0xab   : > { %v608_v62 = vpop.permute.xlu0 %607  ;;  %v477_v16 = vpop.f32.mrf.mxu1  ;;  %v458_v27 = vadd.f32 %v457_v13, %v3156_v17  ;;  %v2550_v63 = vpack.i.bf16 %v631_v46, %v630_v55  ;;  %v683_v13 = vmul.f32 0.0, %v3180_v40 }
  0xac   : > { %929 = vrot.lane.b32.xlu2 %v919_v58, %s2940_s26  ;;  %v478_v32 = vadd.f32 %v477_v16, %v3156_v17  ;;  %v617_v53 = vsel %vm611_vm2, %v3174_v33, %v608_v62  ;;  %v615_v58 = vsel %vm611_vm2, %v3199_v54, %v604_v57 }
  0xad   : > { %927 = vrot.lane.b32.xlu1 %v918_v60, %s2940_s26  ;;  %v497_v10 = vpop.f32.mrf.mxu2  ;;  %v3244_v43 = vmax.f32 %v458_v27, 0.0  ;;  %v632_v1 = vmul.f32 %v615_v58, %v3254_v52 }
  0xae   : > { %v3211_v2 = vpop.permute.xlu2 %707  ;;  %v498_v20 = vadd.f32 %v497_v10, %v3156_v17  ;;  %v3251_v49 = vmax.f32 %v478_v32, 0.0  ;;  %v517_v51 = vpop.f32.mrf.mxu3 }
  0xaf   : > { %v3213_v3 = vpop.permute.xlu1 %609  ;;  %v518_v60 = vadd.f32 %v517_v51, %v3156_v17 }
  0xb0   : > { %v3242_v38 = vmax.f32 %v498_v20, 0.0  ;;  %v618_v44 = vsel %vm611_vm2, %v608_v62, %v3213_v3  ;;  %v633_v62 = vmul.f32 %v616_v24, %v3244_v43 }
  0xb1   : > { %931 = vrot.lane.b32.xlu0 %v920_v0, %s2940_s26  ;;  %v634_v0 = vmul.f32 %v617_v53, %v3251_v49 }
  0xb2   : > { %v635_v50 = vmul.f32 %v618_v44, %v3242_v38 }
  0xb3   : > { %v653_v11 = vpop.permute.xlu0 %652 }
  0xb4   : > { %935 = vrot.lane.b32.xlu2 %v922_v4, %s2940_s26  ;;  %v2560_v54 = vpack.i.bf16 %v635_v50, %v634_v0  ;;  %v3272_v4 = vmax.f32 %v518_v60, 0.0  ;;  %v667_v8 = vsel %vm666_vm3, %v3180_v40, %v653_v11 }
  0xb5   : > { %933 = vrot.lane.b32.xlu1 %v921_v5, %s2940_s26  ;;  %v2555_v5 = vpack.i.bf16 %v633_v62, %v632_v1  ;;  %v684_v15 = vmul.f32 %v667_v8, %v3218_v7 }
  0xb6   : > { %v3227_v21 = vpop.permute.xlu2 %713  ;;  %v636_v14 = vmul.f32 %v3213_v3, %v3272_v4 }
  0xb7   : > { %v655_v28 = vpop.permute.xlu1 %654  ;;  %v2565_v40 = vpack.i.bf16 %v684_v15, %v683_v13 }
  0xb8   : > { %v668_v33 = vsel %vm666_vm3, %v653_v11, %v655_v28  ;;  %v669_v57 = vsel %vm666_vm3, %v655_v28, %v3189_v47 }
  0xb9   : > { %937 = vrot.lane.b32.xlu0 %v923_v19, %s2940_s26  ;;  %v685_v9 = vmul.f32 %v668_v33, %v3237_v34  ;;  %v686_v10 = vmul.f32 %v669_v57, %v3230_v26 }
  0xbb   : > { %v659_v45 = vpop.permute.xlu0 %658  ;;  %v2570_v23 = vpack.i.bf16 %v686_v10, %v685_v9 }
  0xbc   : > { %2546 = vrot.lane.b32.xlu2 %v2545_v39, %s2936_s20  ;;  %v670_v11 = vsel %vm666_vm3, %v3189_v47, %v659_v45 }
  0xbd   : > { %939 = vrot.lane.b32.xlu1 %v924_v37, %s2940_s26  ;;  %v687_v31 = vmul.f32 %v670_v11, %v3254_v52 }
  0xbe   : > { %v3265_v59 = vpop.permute.xlu2 %719 }
  0xbf   : > { %v661_v61 = vpop.permute.xlu1 %660 }
  0xc0   : > { %v671_v20 = vsel %vm666_vm3, %v659_v45, %v661_v61  ;;  %v672_v47 = vsel %vm666_vm3, %v661_v61, %v3202_v56 }
  0xc1   : > { %2551 = vrot.lane.b32.xlu0 %v2550_v63, %s2936_s20  ;;  %v688_v27 = vmul.f32 %v671_v20, %v3244_v43  ;;  %v689_v46 = vmul.f32 %v672_v47, %v3251_v49 }
  0xc3   : > { %v665_v17 = vpop.permute.xlu0 %664  ;;  %v2575_v37 = vpack.i.bf16 %v688_v27, %v687_v31 }
  0xc4   : > { %2561 = vrot.lane.b32.xlu2 %v2560_v54, %s2936_s20  ;;  %v673_v3 = vsel %vm666_vm3, %v3202_v56, %v665_v17  ;;  %v691_v53 = vmul.f32 %v665_v17, %v3272_v4 }
  0xc5   : > { %2556 = vrot.lane.b32.xlu1 %v2555_v5, %s2936_s20  ;;  %v690_v32 = vmul.f32 %v673_v3, %v3242_v38 }
  0xc6   : > { %v765_v16 = vpop.permute.xlu2 %764 }
  0xc7   : > { %v706_v19 = vpop.permute.xlu1 %705  ;;  %v2580_v24 = vpack.i.bf16 %v690_v32, %v689_v46 }
  0xc8   : > { %v722_v39 = vsel %vm721_vm4, %v706_v19, %v3211_v2  ;;  %v738_v55 = vmul.f32 0.0, %v706_v19 }
  0xc9   : > { %992 = vrot.lane.b32.xlu0 %v636_v14, %s2936_s20  ;;  %s2942_s20 = smov 95  }
  0xcb   : > { %v710_v28 = vpop.permute.xlu0 %709 }
  0xcc   : > { %v723_v29 = vsel %vm721_vm4, %v3211_v2, %v710_v28  ;;  %2571 = vrot.lane.b32.xlu2 %v2570_v23, %s2941_s27  ;;  %v739_v2 = vmul.f32 %v722_v39, %v3218_v7 }
  0xcd   : > { %2566 = vrot.lane.b32.xlu1 %v2565_v40, %s2941_s27  ;;  %v3307_v48 = vmul.f32 %v723_v29, %v3237_v34 }
  0xce   : > { %v771_v51 = vpop.permute.xlu2 %770  ;;  %v2585_v62 = vpack.i.bf16 %v739_v2, %v738_v55 }
  0xcf   : > { %v712_v36 = vpop.permute.xlu1 %711 }
  0xd0   : > { %v724_v44 = vsel %vm721_vm4, %v710_v28, %v712_v36  ;;  %v725_v45 = vsel %vm721_vm4, %v712_v36, %v3227_v21 }
  0xd1   : > { %v3310_v56 = vmul.f32 %v724_v44, %v3230_v26  ;;  %2576 = vrot.lane.b32.xlu0 %v2575_v37, %s2941_s27  ;;  %v3319_v61 = vmul.f32 %v725_v45, %v3254_v52 }
  0xd3   : > { %v716_v58 = vpop.permute.xlu0 %715 }
  0xd4   : > { %v726_v60 = vsel %vm721_vm4, %v3227_v21, %v716_v58  ;;  %1027 = vrot.lane.b32.xlu2 %v691_v53, %s2941_s27 }
  0xd5   : > { %v3322_v63 = vmul.f32 %v726_v60, %v3244_v43  ;;  %2581 = vrot.lane.b32.xlu1 %v2580_v24, %s2941_s27 }
  0xd6   : > { %v3336_v17 = vpop.permute.xlu2 %815 }
  0xd7   : > { %v718_v0 = vpop.permute.xlu1 %717 }
  0xd8   : > { %v727_v54 = vsel %vm721_vm4, %v716_v58, %v718_v0  ;;  %v728_v33 = vsel %vm721_vm4, %v718_v0, %v3265_v59 }
  0xd9   : > { %v3330_v21 = vmul.f32 %v727_v54, %v3251_v49  ;;  %v3333_v57 = vmul.f32 %v728_v33, %v3242_v38  ;;  %2586 = vrot.lane.b32.xlu0 %v2585_v62, %s2934_s28 }
  0xdb   : > { %v761_v5 = vpop.permute.xlu0 %760 }
  0xdc   : > { %v3343_v14 = vmul.f32 %v761_v5, %v3218_v7 }
  0xde   : > { %v822_v23 = vpop.permute.xlu2 %821 }
  0xdf   : > { %v763_v9 = vpop.permute.xlu1 %762 }
  0xe0   : > { %v777_v10 = vsel %vm776_vm5, %v761_v5, %v763_v9  ;;  %v778_v13 = vsel %vm776_vm5, %v763_v9, %v765_v16 }
  0xe1   : > { %v3346_v15 = vmul.f32 %v777_v10, %v3237_v34  ;;  %v3352_v27 = vmul.f32 %v778_v13, %v3230_v26 }
  0xe3   : > { %v767_v19 = vpop.permute.xlu0 %766  ;;  %v2620_v20 = vpack.i.bf16 %v3346_v15, %v3343_v14  ;;  %v559_v14 = vsel %vm556_vm1, %v3172_v30, %v3146_v6 }
  0xe4   : > { %v779_v11 = vsel %vm776_vm5, %v765_v16, %v767_v19 }
  0xe5   : > { %v3355_v28 = vmul.f32 %v779_v11, %v3254_v52 }
  0xe6   : > { %v828_v39 = vpop.permute.xlu2 %827 }
  0xe7   : > { %v769_v40 = vpop.permute.xlu1 %768 }
  0xe8   : > { %v780_v29 = vsel %vm776_vm5, %v767_v19, %v769_v40  ;;  %v781_v31 = vsel %vm776_vm5, %v769_v40, %v771_v51 }
  0xe9   : > { %v3362_v47 = vmul.f32 %v780_v29, %v3244_v43  ;;  %v3365_v16 = vmul.f32 %v781_v31, %v3251_v49 }
  0xeb   : > { %v773_v32 = vpop.permute.xlu0 %772  ;;  %v2660_v36 = vpack.i.bf16 %v3365_v16, %v3362_v47 }
  0xec   : > { %v782_v37 = vsel %vm776_vm5, %v771_v51, %v773_v32 }
  0xed   : > { %v3375_v46 = vmul.f32 %v782_v37, %v3242_v38 }
  0xee   : > { %v873_v24 = vpop.permute.xlu2 %872 }
  0xef   : > { %v3370_v44 = vpop.permute.xlu1 %774 }
  0xf0   : > { %v783_v45 = vsel %vm776_vm5, %v773_v32, %v3370_v44 }
  0xf1   : > { %v3378_v53 = vmul.f32 %v783_v45, %v3272_v4 }
  0xf3   : > { %v3380_v55 = vpop.permute.xlu0 %817 }
  0xf6   : > { %v3393_v9 = vpop.permute.xlu2 %878 }
  0xf7   : > { %v820_v58 = vpop.permute.xlu1 %819 }
  0xfb   : > { %v824_v51 = vpop.permute.xlu0 %823 }
  0xfc   : > { %v835_v60 = vsel %vm831_vm6, %v822_v23, %v824_v51 }
  0xfd   : > { %v3388_v33 = vmul.f32 %v835_v60, %v3244_v43 }
  0xff   : > { %v826_v62 = vpop.permute.xlu1 %825 }
 0x100   : > { %v836_v0 = vsel %vm831_vm6, %v824_v51, %v826_v62  ;;  %v837_v54 = vsel %vm831_vm6, %v826_v62, %v828_v39  ;;  %v834_v62 = vsel %vm831_vm6, %v820_v58, %v822_v23 }
 0x101   : > { %v3391_v5 = vmul.f32 %v836_v0, %v3251_v49  ;;  %v3402_v11 = vmul.f32 %v837_v54, %v3242_v38  ;;  %v3415_v0 = vpop.permute.xlu2 %884 }
 0x103   : > { %v3395_v10 = vpop.permute.xlu0 %829 }
 0x104   : > { %v838_v19 = vsel %vm831_vm6, %v828_v39, %v3395_v10  ;;  %v833_v39 = vsel %vm831_vm6, %v3380_v55, %v820_v58  ;;  %v2630_v58 = vpack.i.bf16 %v3237_v34, %v3218_v7 }
 0x105   : > { %v3405_v40 = vmul.f32 %v838_v19, %v3272_v4  ;;  %v850_v54 = vmul.f32 %v833_v39, %v3230_v26  ;;  %v851_v19 = vmul.f32 %v834_v62, %v3254_v52 }
 0x107   : > { %v871_v29 = vpop.permute.xlu1 %870 }
 0x108   : > { %v887_v32 = vsel %vm886_vm7, %v871_v29, %v873_v24  ;;  %v903_v37 = vmul.f32 %v871_v29, %v3218_v7 }
 0x109   : > { %v904_v45 = vmul.f32 %v887_v32, %v3237_v34  ;;  %v2615_v32 = vpack.i.bf16 %v851_v19, %v850_v54 }
 0x10b   : > { %v2600_v51 = vpack.i.bf16 %v904_v45, %v903_v37  ;;  %v875_v60 = vpop.permute.xlu0 %874  ;;  %v930_v37 = vpop.permute.xlu2 %929 }
 0x10d   : > { %2601 = vrot.lane.b32.xlu0 %v2600_v51, %s2942_s20 }
 0x10f   : > { %v3420_v8 = vpop.permute.xlu1 %876 }
 0x110   : > { %v889_v13 = vsel %vm886_vm7, %v875_v60, %v3420_v8 }
 0x113   : > { %v3422_v29 = vpop.permute.xlu0 %880  ;;  %v936_v62 = vpop.permute.xlu2 %935 }
 0x115   : > { %2616 = vrot.lane.b32.xlu0 %v2615_v32, %s2943_s29 }
 0x117   : > { %v3425_v45 = vpop.permute.xlu1 %882 }
 0x11b   : > { %v926_v23 = vpop.permute.xlu0 %925 }
 0x11c   : > { %v958_v31 = vmul.f32 %v926_v23, %v3218_v7 }
 0x11d   : > { %2631 = vrot.lane.b32.xlu0 %v2630_v58, %s2932_s18 }
 0x11f   : > { %v928_v51 = vpop.permute.xlu1 %927 }
 0x120   : > { %v942_v39 = vsel %vm941_vm8, %v926_v23, %v928_v51  ;;  %v943_v19 = vsel %vm941_vm8, %v928_v51, %v930_v37  ;;  %v888_v23 = vsel %vm886_vm7, %v873_v24, %v875_v60 }
 0x121   : > { %v959_v54 = vmul.f32 %v942_v39, %v3237_v34  ;;  %v960_v58 = vmul.f32 %v943_v19, %v3230_v26  ;;  %v906_v39 = vmul.f32 %v889_v13, %v3254_v52  ;;  %v905_v19 = vmul.f32 %v888_v23, %v3230_v26  ;;  %v3452_v13 = vpop.permute.xlu2 %2546 }
 0x123   : > { %v932_v32 = vpop.permute.xlu0 %931  ;;  %v2590_v1 = vpack.i.bf16 %v959_v54, %v958_v31  ;;  %v832_v31 = vsel %vm831_vm6, %v3336_v17, %v3380_v55  ;;  %v848_v55 = vmul.f32 %v3336_v17, %v3218_v7 }
 0x124   : > { %v944_v2 = vsel %vm941_vm8, %v930_v37, %v932_v32  ;;  %v849_v24 = vmul.f32 %v832_v31, %v3237_v34 }
 0x125   : > { %v961_v50 = vmul.f32 %v944_v2, %v3254_v52  ;;  %2591 = vrot.lane.b32.xlu1 %v2590_v1, %s2944_s11 }
 0x127   : > { %v934_v3 = vpop.permute.xlu1 %933  ;;  %v2595_v51 = vpack.i.bf16 %v961_v50, %v960_v58  ;;  %v2605_v58 = vpack.i.bf16 %v906_v39, %v905_v19 }
 0x128   : > { %v945_v54 = vsel %vm941_vm8, %v932_v32, %v934_v3  ;;  %v946_v37 = vsel %vm941_vm8, %v934_v3, %v936_v62  ;;  %v2610_v32 = vpack.i.bf16 %v849_v24, %v848_v55 }
 0x129   : > { %v962_v2 = vmul.f32 %v945_v54, %v3244_v43  ;;  %v963_v1 = vmul.f32 %v946_v37, %v3251_v49  ;;  %2596 = vrot.lane.b32.xlu2 %v2595_v51, %s2944_s11  ;;  %v2549_v51 = vunpack.i.h.bf16 %v3452_v13 }
 0x12b   : > { %v938_v50 = vpop.permute.xlu0 %937  ;;  %v2645_v60 = vpack.i.bf16 %v963_v1, %v962_v2  ;;  %v3461_v2 = vpop.permute.xlu2 %2561 }
 0x12c   : > { %v947_v17 = vsel %vm941_vm8, %v936_v62, %v938_v50  ;;  %v4565_v15 = vunpack.i.l.bf16 %v3461_v2  ;;  %v4572_v62 = vpack.i.bf16 %v3355_v28, %v3352_v27 }
 0x12d   : > { %2646 = vrot.lane.b32.xlu0 %v2645_v60, %s2944_s11  ;;  %2606 = vrot.lane.b32.xlu1 %v2605_v58, %s2942_s20  ;;  %v3497_v60 = vmul.f32 %v559_v14, %v3230_v26  ;;  %v4566_v58 = vunpack.i.h.bf16 %v3461_v2 }
 0x12f   : > { %v940_v3 = vpop.permute.xlu1 %939 }
 0x130   : > { %v948_v31 = vsel %vm941_vm8, %v938_v50, %v940_v3  ;;  %v3494_v50 = vmul.f32 %v3187_v42, %v3242_v38 }
 0x131   : > { %2611 = vrot.lane.b32.xlu2 %v2610_v32, %s2943_s29  ;;  %v965_v1 = vmul.f32 %v948_v31, %v3272_v4 }
 0x133   : > { %v2552_v23 = vpop.permute.xlu0 %2551 }
 0x134   : > { %v2554_v54 = vunpack.i.h.bf16 %v2552_v23  ;;  %v2553_v37 = vunpack.i.l.bf16 %v2552_v23  ;;  %v2635_v23 = vpack.i.bf16 %v3254_v52, %v3230_v26  ;;  %v890_v26 = vsel %vm886_vm7, %v3420_v8, %v3393_v9 }
 0x135   : > { %2661 = vrot.lane.b32.xlu0 %v2660_v36, %s2945_s12  ;;  %2621 = vrot.lane.b32.xlu1 %v2620_v20, %s2945_s12  ;;  %v964_v36 = vmul.f32 %v947_v17, %v3242_v38 }
 0x136   : > { %v3475_v39 = vsel %vm721_vm4, %v2549_v51, %v2553_v37  ;;  %v3478_v19 = vsel %vm721_vm4, %v2553_v37, %v2554_v54  ;;  %v891_v37 = vsel %vm886_vm7, %v3393_v9, %v3422_v29 }
 0x137   : > { %v2557_v24 = vpop.permute.xlu1 %2556  ;;  %v2675_v42 = vpack.i.bf16 %v965_v1, %v964_v36  ;;  %v908_v1 = vmul.f32 %v891_v37, %v3251_v49 }
 0x138   : > { %v2559_v20 = vunpack.i.h.bf16 %v2557_v24  ;;  %v2558_v16 = vunpack.i.l.bf16 %v2557_v24  ;;  %v3534_v24 = vpop.permute.xlu2 %2571 }
 0x139   : > { %2626 = vrot.lane.b32.xlu2 %v4572_v62, %s2945_s12 }
 0x13a   : > { %v3503_v55 = vsel %vm721_vm4, %v2559_v20, %v4565_v15  ;;  %v3506_v32 = vsel %vm721_vm4, %v2554_v54, %v2558_v16  ;;  %v3509_v27 = vsel %vm721_vm4, %v2558_v16, %v2559_v20  ;;  %v907_v20 = vmul.f32 %v890_v26, %v3244_v43 }
 0x13b   : > { %v3511_v28 = vpop.permute.xlu0 %992  ;;  %v4573_v16 = vpack.i.bf16 %v3310_v56, %v3307_v48 }
 0x13c   : > { %v3526_v17 = vsel %vm721_vm4, %v4566_v58, %v3511_v28  ;;  %v2650_v62 = vpack.i.bf16 %v908_v1, %v907_v20  ;;  %v4575_v20 = vpack.i.bf16 %v3391_v5, %v3388_v33 }
 0x13d   : > { %2676 = vrot.lane.b32.xlu0 %v2675_v42, %s2944_s11  ;;  %2636 = vrot.lane.b32.xlu1 %v2635_v23, %s2932_s18  ;;  %v2574_v42 = vunpack.i.h.bf16 %v3534_v24  ;;  %v4574_v23 = vpack.i.bf16 %v3378_v53, %v3375_v46  ;;  %v966_v53 = vmul.f32 0.0, %v940_v3  ;;  %v892_v3 = vsel %vm886_vm7, %v3422_v29, %v3425_v45 }
 0x13e   : > { %v909_v33 = vmul.f32 %v892_v3, %v3242_v38  ;;  %v4577_v29 = vpack.i.bf16 %v3405_v40, %v3402_v11 }
 0x13f   : > { %v3536_v14 = vpop.permute.xlu1 %2566 }
 0x140   : > { %v3568_v1 = vpop.permute.xlu2 %1027 }
 0x141   : > { %2641 = vrot.lane.b32.xlu2 %v4573_v16, %s2934_s28 }
 0x143   : > { %v3543_v36 = vpop.permute.xlu0 %2576 }
 0x144   : > { %v4568_v8 = vunpack.i.h.bf16 %v3543_v36  ;;  %v2578_v9 = vunpack.i.l.bf16 %v3543_v36 }
 0x145   : > { %2691 = vrot.lane.b32.xlu0 %v4574_v23, %s2945_s12  ;;  %2651 = vrot.lane.b32.xlu1 %v2650_v62, %s2942_s20  ;;  %v2665_v62 = vpack.i.bf16 %v3251_v49, %v3244_v43  ;;  %v4576_v23 = vpack.i.bf16 %v3322_v63, %v3319_v61 }
 0x146   : > { %v3556_v48 = vsel %vm1029_vm9, %v2574_v42, %v2578_v9  ;;  %v3561_v56 = vsel %vm1029_vm9, %v2578_v9, %v4568_v8  ;;  %v893_v9 = vsel %vm886_vm7, %v3425_v45, %v3415_v0  ;;  %v2695_v45 = vpack.i.bf16 %v3272_v4, %v3242_v38 }
 0x147   : > { %v3563_v37 = vpop.permute.xlu1 %2581  ;;  %v910_v5 = vmul.f32 %v893_v9, %v3272_v4 }
 0x148   : > { %v4567_v46 = vunpack.i.h.bf16 %v3563_v37 }
 0x149   : > { %2656 = vrot.lane.b32.xlu2 %v4575_v20, %s2943_s29  ;;  %v2680_v20 = vpack.i.bf16 %v910_v5, %v909_v33 }
 0x14a   : > { %v3578_v16 = vsel %vm1029_vm9, %v4567_v46, %v3568_v1 }
 0x14b   : > { %v3608_v61 = vpop.permute.xlu0 %2586 }
 0x14d   : > { %1237 = vrot.lane.b32.xlu0 %v966_v53, %s2944_s11  ;;  %2666 = vrot.lane.b32.xlu1 %v2665_v62, %s2932_s18  ;;  %v4578_v53 = vpack.i.bf16 %v3333_v57, %v3330_v21 }
 0x151   : > { %2671 = vrot.lane.b32.xlu2 %v4576_v23, %s2934_s28 }
 0x155   : > { %2681 = vrot.lane.b32.xlu1 %v2680_v20, %s2942_s20 }
 0x159   : > { %2686 = vrot.lane.b32.xlu2 %v4577_v29, %s2943_s29 }
 0x15d   : > { %2696 = vrot.lane.b32.xlu1 %v2695_v45, %s2932_s18 }
 0x165   : > { %2701 = vrot.lane.b32.xlu1 %v4578_v53, %s2934_s28 }
 0x17f   : > { %v2602_v63 = vpop.permute.xlu0 %2601 }
 0x180   : > { %v2603_v29 = vunpack.i.l.bf16 %v2602_v63 }
 0x183   : > { %v3610_v62 = vpop.permute.xlu2 %2596 }
 0x184   : > { %v2598_v57 = vunpack.i.l.bf16 %v3610_v62 }
 0x187   : > { %v3612_v11 = vpop.permute.xlu0 %2616 }
 0x18b   : > { %v2612_v3 = vpop.permute.xlu2 %2611 }
 0x18c   : > { %v2614_v9 = vunpack.i.h.bf16 %v2612_v3  ;;  %v2613_v33 = vunpack.i.l.bf16 %v2612_v3 }
 0x18e   : > { %v1168_v38 = vsel %vm1167_vm10, %v2613_v33, %v2614_v9 }
 0x18f   : > { %v2710_v40 = vpack.i.bf16 %v1168_v38, %v2613_v33  ;;  %v3616_v5 = vpop.permute.xlu0 %2631  ;;  %v2604_v33 = vunpack.i.h.bf16 %v2602_v63 }
 0x191   : > { %2711 = vrot.lane.b32.xlu1 %v2710_v40, %s2940_s26  ;;  %v1204_v63 = vsel %vm1203_vm12, %v2603_v29, %v2604_v33 }
 0x193   : > { %v3632_v15 = vpop.permute.xlu2 %2626 }
 0x194   : > { %v4571_v8 = vunpack.i.l.bf16 %v3632_v15 }
 0x197   : > { %v2592_v21 = vpop.permute.xlu1 %2591 }
 0x198   : > { %v2594_v23 = vunpack.i.h.bf16 %v2592_v21  ;;  %v2593_v20 = vunpack.i.l.bf16 %v2592_v21  ;;  %v560_v21 = vsel %vm556_vm1, %v3146_v6, %v3154_v12  ;;  %v911_v12 = vmul.f32 0.0, %v3415_v0 }
 0x19a   : > { %v1240_v45 = vsel %vm1239_vm11, %v2593_v20, %v2594_v23  ;;  %v1241_v53 = vsel %vm1239_vm11, %v2594_v23, %v2598_v57 }
 0x19b   : > { %v2705_v3 = vpack.i.bf16 %v1240_v45, %v2593_v20  ;;  %v2715_v54 = vpack.i.bf16 %v2603_v29, %v1241_v53  ;;  %v4570_v29 = vunpack.i.l.bf16 %v3612_v11 }
 0x19d   : > { %2706 = vrot.lane.b32.xlu2 %v2705_v3, %s2940_s26  ;;  %2716 = vrot.lane.b32.xlu0 %v2715_v54, %s2940_s26  ;;  %v3638_v54 = vmul.f32 %v560_v21, %v3254_v52  ;;  %v2634_v52 = vunpack.i.h.bf16 %v3616_v5  ;;  %v2633_v21 = vunpack.i.l.bf16 %v3616_v5  ;;  %v1169_v31 = vsel %vm1167_vm10, %v2614_v9, %v4570_v29  ;;  %v3664_v5 = vpop.permute.xlu2 %2641 }
 0x19e   : > { %v2643_v47 = vunpack.i.l.bf16 %v3664_v5  ;;  %v2589_v9 = vunpack.i.h.bf16 %v3608_v61 }
 0x19f   : > { %v3625_v38 = vpop.permute.xlu0 %2646  ;;  %v3627_v40 = vpop.permute.xlu1 %2606 }
 0x1a0   : > { %v4569_v23 = vunpack.i.h.bf16 %v3625_v38  ;;  %v2648_v20 = vunpack.i.l.bf16 %v3625_v38  ;;  %v2608_v45 = vunpack.i.l.bf16 %v3627_v40 }
 0x1a2   : > { %v1205_v53 = vsel %vm1203_vm12, %v2604_v33, %v2608_v45  ;;  %v3647_v6 = vsel %vm1239_vm11, %v2648_v20, %v4569_v23 }
 0x1a3   : > { %v2720_v3 = vpack.i.bf16 %v1205_v53, %v1204_v63  ;;  %v1097_v53 = vsel %vm556_vm1, %v2633_v21, %v2634_v52 }
 0x1a4   : > { %v2735_v26 = vpack.i.bf16 %v1097_v53, %v2633_v21  ;;  %v1066_v21 = vsel %vm611_vm2, %v2589_v9, %v2643_v47 }
 0x1a5   : > { %2721 = vrot.lane.b32.xlu2 %v2720_v3, %s2940_s26  ;;  %1201 = vrot.lane.b32.xlu0 %v911_v12, %s2942_s20 }
 0x1a7   : > { %v3657_v33 = vpop.permute.xlu0 %2661  ;;  %v2622_v46 = vpop.permute.xlu1 %2621 }
 0x1a8   : > { %v2624_v0 = vunpack.i.h.bf16 %v2622_v46  ;;  %v2623_v63 = vunpack.i.l.bf16 %v2622_v46  ;;  %v2644_v46 = vunpack.i.h.bf16 %v3664_v5  ;;  %v4583_v5 = vpack.i.bf16 %v3647_v6, %v3638_v54 }
 0x1aa   : > { %v2725_v3 = vpack.i.bf16 %v2623_v63, %v1169_v31  ;;  %v1132_v12 = vsel %vm1131_vm13, %v2623_v63, %v2624_v0  ;;  %v1133_v23 = vsel %vm1131_vm13, %v2624_v0, %v4571_v8  ;;  %v2588_v31 = vunpack.i.l.bf16 %v3608_v61 }
 0x1ab   : > { %v2730_v58 = vpack.i.bf16 %v1133_v23, %v1132_v12  ;;  %v1067_v0 = vsel %vm611_vm2, %v2643_v47, %v2644_v46  ;;  %v2568_v12 = vunpack.i.l.bf16 %v3536_v14  ;;  %v2573_v47 = vunpack.i.l.bf16 %v3534_v24 }
 0x1ac   : > { %v2745_v8 = vpack.i.bf16 %v1067_v0, %v1066_v21  ;;  %v801_v0 = vmul.f32 0.0, %v3370_v44  ;;  %v3716_v44 = vpop.permute.xlu2 %2656  ;;  %v557_v24 = vsel %vm556_vm1, %v3164_v25, %v3160_v22 }
 0x1ad   : > { %2726 = vrot.lane.b32.xlu2 %v2725_v3, %s2940_s26  ;;  %2731 = vrot.lane.b32.xlu1 %v2730_v58, %s2940_s26  ;;  %v1065_v58 = vsel %vm611_vm2, %v2588_v31, %v2589_v9  ;;  %v2569_v3 = vunpack.i.h.bf16 %v3536_v14  ;;  %v2548_v9 = vunpack.i.l.bf16 %v3452_v13 }
 0x1ae   : > { %2736 = vrot.lane.b32.xlu0 %v2735_v26, %s2940_s26  ;;  %v856_v26 = vmul.f32 0.0, %v3395_v10 }
 0x1af   : > { %v3677_v63 = vpop.permute.xlu0 %2676  ;;  %v3679_v29 = vpop.permute.xlu1 %2636  ;;  %v1030_v10 = vsel %vm1029_vm9, %v2568_v12, %v2569_v3 }
 0x1b0   : > { %v2638_v23 = vunpack.i.l.bf16 %v3679_v29 }
 0x1b2   : > { %v1098_v61 = vsel %vm556_vm1, %v2634_v52, %v2638_v23  ;;  %v2599_v52 = vunpack.i.h.bf16 %v3610_v62 }
 0x1b3   : > { %v2740_v53 = vpack.i.bf16 %v1065_v58, %v1098_v61  ;;  %v1031_v58 = vsel %vm1029_vm9, %v2569_v3, %v2573_v47  ;;  %v2679_v3 = vunpack.i.h.bf16 %v3677_v63 }
 0x1b4   : > { %v1243_v14 = vsel %vm1239_vm11, %v2599_v52, %v2648_v20  ;;  %v2750_v61 = vpack.i.bf16 %v1031_v58, %v1030_v10  ;;  %v2609_v20 = vunpack.i.h.bf16 %v3627_v40  ;;  %v1032_v58 = vsel %vm1029_vm9, %v2573_v47, %v2574_v42 }
 0x1b5   : > { %1165 = vrot.lane.b32.xlu2 %v856_v26, %s2943_s29  ;;  %2741 = vrot.lane.b32.xlu1 %v2740_v53, %s2940_s26  ;;  %v2629_v42 = vunpack.i.h.bf16 %v3632_v15  ;;  %v574_v40 = vmul.f32 %v557_v24, %v3218_v7 }
 0x1b6   : > { %2746 = vrot.lane.b32.xlu0 %v2745_v8, %s2940_s26  ;;  %v994_v8 = vsel %vm721_vm4, %v2548_v9, %v2549_v51  ;;  %v1242_v51 = vsel %vm1239_vm11, %v2598_v57, %v2599_v52  ;;  %v1206_v62 = vsel %vm1203_vm12, %v2608_v45, %v2609_v20  ;;  %v573_v45 = vmul.f32 0.0, %v3164_v25 }
 0x1b7   : > { %v3699_v31 = vpop.permute.xlu0 %2691  ;;  %v3704_v21 = vpop.permute.xlu1 %2651  ;;  %v2760_v26 = vpack.i.bf16 %v994_v8, %v1243_v14  ;;  %v746_v14 = vmul.f32 %v3265_v59, %v3272_v4  ;;  %v2619_v59 = vunpack.i.h.bf16 %v3612_v11  ;;  %v4580_v25 = vpack.i.bf16 %v3478_v19, %v3475_v39 }
 0x1b8   : > { %v2653_v53 = vunpack.i.l.bf16 %v3704_v21  ;;  %v3755_v8 = vpop.permute.xlu2 %2671 }
 0x1b9   : > { %v2673_v7 = vunpack.i.l.bf16 %v3755_v8 }
 0x1ba   : > { %v1207_v10 = vsel %vm1203_vm12, %v2609_v20, %v2653_v53 }
 0x1bb   : > { %v2770_v52 = vpack.i.bf16 %v1207_v10, %v1206_v62  ;;  %v4581_v62 = vunpack.i.l.bf16 %v3612_v11 }
 0x1bd   : > { %1129 = vrot.lane.b32.xlu2 %v801_v0, %s2945_s12  ;;  %2751 = vrot.lane.b32.xlu1 %v2750_v61, %s2940_s26  ;;  %v2755_v0 = vpack.i.bf16 %v1242_v51, %v1032_v58  ;;  %v2658_v61 = vunpack.i.l.bf16 %v3716_v44  ;;  %v2639_v51 = vunpack.i.h.bf16 %v3679_v29  ;;  %v2674_v58 = vunpack.i.h.bf16 %v3755_v8 }
 0x1be   : > { %2761 = vrot.lane.b32.xlu0 %v2760_v26, %s2940_s26  ;;  %v4579_v26 = vunpack.i.l.bf16 %v3632_v15  ;;  %v4589_v8 = vunpack.i.l.bf16 %v3461_v2 }
 0x1bf   : > { %v1238_v12 = vpop.permute.xlu0 %1237  ;;  %v3739_v57 = vpop.permute.xlu1 %2666  ;;  %v1171_v47 = vsel %vm1167_vm10, %v2619_v59, %v2658_v61  ;;  %v1099_v39 = vsel %vm556_vm1, %v2638_v23, %v2639_v51  ;;  %v1069_v24 = vsel %vm611_vm2, %v2673_v7, %v2674_v58  ;;  %v1068_v23 = vsel %vm611_vm2, %v2644_v46, %v2673_v7 }
 0x1c0   : > { %v3721_v13 = vsel %vm1239_vm11, %v2679_v3, %v1238_v12  ;;  %v1134_v20 = vsel %vm1131_vm13, %v4579_v26, %v2629_v42  ;;  %v2775_v12 = vpack.i.bf16 %v574_v40, %v573_v45  ;;  %v3794_v29 = vpop.permute.xlu2 %2686  ;;  %v4582_v26 = vpack.i.bf16 %v3506_v32, %v3561_v56 }
 0x1c1   : > { %v2855_v9 = vpack.i.bf16 %v3503_v55, %v3721_v13  ;;  %v2785_v10 = vpack.i.bf16 %v1134_v20, %v1171_v47  ;;  %v2678_v20 = vunpack.i.l.bf16 %v3677_v63  ;;  %v2659_v46 = vunpack.i.h.bf16 %v3716_v44 }
 0x1c2   : > { %v4584_v32 = vunpack.i.h.bf16 %v3625_v38  ;;  %v2669_v6 = vunpack.i.h.bf16 %v3739_v57  ;;  %v2693_v38 = vunpack.i.l.bf16 %v3699_v31 }
 0x1c4   : > { %v1245_v56 = vsel %vm1239_vm11, %v4584_v32, %v2678_v20 }
 0x1c5   : > { %2756 = vrot.lane.b32.xlu2 %v2755_v0, %s2940_s26  ;;  %1063 = vrot.lane.b32.xlu1 %v746_v14, %s2934_s28  ;;  %v2663_v14 = vunpack.i.l.bf16 %v3657_v33  ;;  %v558_v0 = vsel %vm556_vm1, %v3160_v22, %v3172_v30  ;;  %v2668_v22 = vunpack.i.l.bf16 %v3739_v57  ;;  %v2800_v30 = vpack.i.bf16 %v3556_v48, %v1069_v24 }
 0x1c6   : > { %2771 = vrot.lane.b32.xlu0 %v2770_v52, %s2940_s26  ;;  %v1170_v52 = vsel %vm1167_vm10, %v4581_v62, %v2619_v59  ;;  %v575_v19 = vmul.f32 %v558_v0, %v3237_v34  ;;  %v2688_v48 = vunpack.i.l.bf16 %v3794_v29  ;;  %v4585_v62 = vpack.i.bf16 %v3497_v60, %v3509_v27 }
 0x1c7   : > { %v3769_v15 = vpop.permute.xlu1 %2681  ;;  %v1135_v40 = vsel %vm1131_vm13, %v2629_v42, %v2663_v14  ;;  %v1100_v34 = vsel %vm556_vm1, %v2639_v51, %v2668_v22  ;;  %v2654_v42 = vunpack.i.h.bf16 %v3704_v21  ;;  %v2583_v57 = vunpack.i.l.bf16 %v3563_v37 }
 0x1c8   : > { %v2780_v45 = vpack.i.bf16 %v1170_v52, %v575_v19  ;;  %v2790_v47 = vpack.i.bf16 %v1099_v39, %v1135_v40  ;;  %v2795_v59 = vpack.i.bf16 %v1068_v23, %v1100_v34  ;;  %v2683_v0 = vunpack.i.l.bf16 %v3769_v15 }
 0x1c9   : > { %v1208_v51 = vsel %vm1203_vm12, %v2653_v53, %v2654_v42  ;;  %v1101_v52 = vsel %vm556_vm1, %v2668_v22, %v2669_v6  ;;  %v1172_v60 = vsel %vm1167_vm10, %v2658_v61, %v2659_v46  ;;  %v4586_v24 = vunpack.i.h.bf16 %v3543_v36 }
 0x1ca   : > { %v2820_v54 = vpack.i.bf16 %v1208_v51, %v1245_v56  ;;  %v1246_v36 = vsel %vm1239_vm11, %v2678_v20, %v2679_v3  ;;  %v4587_v34 = vunpack.i.h.bf16 %v3563_v37  ;;  %v579_v51 = vmul.f32 %v3183_v41, %v3251_v49 }
 0x1cb   : > { %v1035_v40 = vsel %vm1029_vm9, %v4586_v24, %v2583_v57  ;;  %v2694_v56 = vunpack.i.h.bf16 %v3699_v31 }
 0x1cc   : > { %v1036_v23 = vsel %vm1029_vm9, %v2583_v57, %v4587_v34 }
 0x1cd   : > { %2766 = vrot.lane.b32.xlu2 %v4580_v25, %s2940_s26  ;;  %2776 = vrot.lane.b32.xlu1 %v2775_v12, %s2940_s26  ;;  %v2664_v12 = vunpack.i.h.bf16 %v3657_v33  ;;  %v2850_v63 = vpack.i.bf16 %v1246_v36, %v1036_v23 }
 0x1ce   : > { %2786 = vrot.lane.b32.xlu0 %v2785_v10, %s2940_s26  ;;  %v1173_v10 = vsel %vm1167_vm10, %v2659_v46, %v2688_v48  ;;  %v2689_v46 = vunpack.i.h.bf16 %v3794_v29 }
 0x1cf   : > { %v3791_v11 = vpop.permute.xlu1 %2696  ;;  %v1136_v25 = vsel %vm1131_vm13, %v2663_v14, %v2664_v12  ;;  %v1209_v14 = vsel %vm1203_vm12, %v2654_v42, %v2683_v0  ;;  %v1137_v27 = vsel %vm1131_vm13, %v2664_v12, %v2693_v38  ;;  %v4588_v42 = vunpack.i.h.bf16 %v3461_v2 }
 0x1d0   : > { %v2830_v33 = vpack.i.bf16 %v1136_v25, %v1173_v10  ;;  %v2825_v19 = vpack.i.bf16 %v1172_v60, %v1209_v14  ;;  %v2698_v22 = vunpack.i.l.bf16 %v3791_v11  ;;  %v1174_v12 = vsel %vm1167_vm10, %v2688_v48, %v2689_v46 }
 0x1d1   : > { %v2870_v10 = vpack.i.bf16 %v1174_v12, %v579_v51  ;;  %v2699_v24 = vunpack.i.h.bf16 %v3791_v11 }
 0x1d5   : > { %2781 = vrot.lane.b32.xlu2 %v2780_v45, %s2940_s26  ;;  %2791 = vrot.lane.b32.xlu1 %v2790_v47, %s2940_s26  ;;  %v2835_v45 = vpack.i.bf16 %v1101_v52, %v1137_v27 }
 0x1d6   : > { %2801 = vrot.lane.b32.xlu0 %v2800_v30, %s2940_s26  ;;  %v2684_v30 = vunpack.i.h.bf16 %v3769_v15  ;;  %v1102_v15 = vsel %vm556_vm1, %v2669_v6, %v2698_v22 }
 0x1d7   : > { %v3817_v7 = vpop.permute.xlu1 %2701 }
 0x1d8   : > { %v2704_v21 = vunpack.i.h.bf16 %v3817_v7  ;;  %v2703_v53 = vunpack.i.l.bf16 %v3817_v7  ;;  %v1210_v61 = vsel %vm1203_vm12, %v2683_v0, %v2684_v30 }
 0x1da   : > { %v1071_v39 = vsel %vm611_vm2, %v2703_v53, %v2704_v21  ;;  %v1070_v44 = vsel %vm611_vm2, %v2674_v58, %v2703_v53  ;;  %v1000_v58 = vsel %vm721_vm4, %v4589_v8, %v4588_v42 }
 0x1db   : > { %v2845_v47 = vpack.i.bf16 %v1035_v40, %v1071_v39  ;;  %v578_v39 = vmul.f32 %v3178_v35, %v3244_v43 }
 0x1dd   : > { %2796 = vrot.lane.b32.xlu2 %v2795_v59, %s2940_s26  ;;  %2806 = vrot.lane.b32.xlu1 %v4582_v26, %s2940_s26  ;;  %v2840_v59 = vpack.i.bf16 %v1070_v44, %v1102_v15  ;;  %v2860_v26 = vpack.i.bf16 %v1210_v61, %v1000_v58  ;;  %v1103_v61 = vsel %vm556_vm1, %v2698_v22, %v2699_v24 }
 0x1de   : > { %2816 = vrot.lane.b32.xlu0 %v4583_v5, %s2940_s26 }
 0x1e5   : > { %2811 = vrot.lane.b32.xlu2 %v4585_v62, %s2940_s26  ;;  %2821 = vrot.lane.b32.xlu1 %v2820_v54, %s2940_s26 }
 0x1e6   : > { %2831 = vrot.lane.b32.xlu0 %v2830_v33, %s2940_s26 }
 0x1ed   : > { %2826 = vrot.lane.b32.xlu2 %v2825_v19, %s2940_s26  ;;  %2836 = vrot.lane.b32.xlu1 %v2835_v45, %s2940_s26 }
 0x1ee   : > { %2846 = vrot.lane.b32.xlu0 %v2845_v47, %s2940_s26 }
 0x1f5   : > { %2841 = vrot.lane.b32.xlu2 %v2840_v59, %s2940_s26  ;;  %2851 = vrot.lane.b32.xlu1 %v2850_v63, %s2940_s26 }
 0x1f6   : > { %2861 = vrot.lane.b32.xlu0 %v2860_v26, %s2940_s26 }
 0x1f7   : > { %v2707_v3 = vpop.permute.xlu2 %2706 }
 0x1f8   : > { %v2709_v20 = vunpack.i.h.bf16 %v2707_v3  ;;  %v2708_v37 = vunpack.i.l.bf16 %v2707_v3 }
 0x1fa   : > { %v1490_v5 = vsel %vm941_vm8, %v2708_v37, %v2709_v20 }
 0x1fb   : > { %1581 = vmatpush.msra.mxu2 %v1490_v5 }
 0x1fd   : > { %2856 = vrot.lane.b32.xlu2 %v2855_v9, %s2940_s26  ;;  %v1138_v9 = vsel %vm1131_vm13, %v2693_v38, %v2694_v56 }
 0x1ff   : > { %v3879_v2 = vpop.permute.xlu2 %2721 }
 0x200   : > { %v2724_v25 = vunpack.i.h.bf16 %v3879_v2  ;;  %v2723_v55 = vunpack.i.l.bf16 %v3879_v2 }
 0x202   : > { %v1483_v57 = vsel %vm941_vm8, %v2723_v55, %v2724_v25 }
 0x203   : > { %v2712_v29 = vpop.permute.xlu1 %2711 }
 0x204   : > { %v2714_v13 = vunpack.i.h.bf16 %v2712_v29  ;;  %v2713_v6 = vunpack.i.l.bf16 %v2712_v29 }
 0x205   : > { %2871 = vrot.lane.b32.xlu2 %v2870_v10, %s2940_s26 }
 0x206   : > { %v1474_v38 = vsel %vm941_vm8, %v2713_v6, %v2714_v13 }
 0x207   : > { %v3885_v32 = vpop.permute.xlu2 %2726 }
 0x208   : > { %v2728_v53 = vunpack.i.l.bf16 %v3885_v32  ;;  %v2729_v44 = vunpack.i.h.bf16 %v3885_v32  ;;  %v1249_v32 = vld [vmem:[%s4560_s5] sm:$0xff] }
 0x20a   : > { %v1475_v14 = vsel %vm941_vm8, %v2714_v13, %v2728_v53 }
 0x20f   : > { %v1166_v54 = vpop.permute.xlu2 %1165  ;;  %v2717_v48 = vpop.permute.xlu0 %2716 }
 0x210   : > { %v1175_v41 = vsel %vm1167_vm10, %v2689_v46, %v1166_v54  ;;  %v2719_v49 = vunpack.i.h.bf16 %v2717_v48  ;;  %v2718_v0 = vunpack.i.l.bf16 %v2717_v48  ;;  %v2895_v46 = vpack.i.bf16 %v3526_v17, %v3568_v1 }
 0x211   : > { %v2875_v33 = vpack.i.bf16 %v1138_v9, %v1175_v41 }
 0x212   : > { %v1482_v31 = vsel %vm941_vm8, %v2719_v49, %v2723_v55  ;;  %v1491_v62 = vsel %vm941_vm8, %v2709_v20, %v2718_v0 }
 0x213   : > { %1582 = vmatpush.msra.mxu2 %v1482_v31  ;;  %1601 = vmatpush.msra.mxu3 %v1491_v62 }
 0x214   : > { %2876 = vrot.lane.b32.xlu0 %v2875_v33, %s2940_s26 }
 0x215   : > { %1583 = vmatpush.msra.mxu2 %v1474_v38  ;;  %1602 = vmatpush.msra.mxu3 %v1483_v57 }
 0x217   : > { %v1130_v52 = vpop.permute.xlu2 %1129  ;;  %v1202_v60 = vpop.permute.xlu0 %1201  ;;  %1603 = vmatpush.msra.mxu3 %v1475_v14 }
 0x218   : > { %v1211_v27 = vsel %vm1203_vm12, %v2684_v30, %v1202_v60  ;;  %v1139_v40 = vsel %vm1131_vm13, %v2694_v56, %v1130_v52 }
 0x219   : > { %v2865_v19 = vpack.i.bf16 %v578_v39, %v1211_v27  ;;  %v2880_v23 = vpack.i.bf16 %v1103_v61, %v1139_v40 }
 0x21b   : > { %2866 = vrot.lane.b32.xlu1 %v2865_v19, %s2940_s26 }
 0x21f   : > { %v3909_v45 = vpop.permute.xlu1 %2731  ;;  %v3911_v47 = vpop.permute.xlu2 %2756 }
 0x220   : > { %v2734_v36 = vunpack.i.h.bf16 %v3909_v45  ;;  %v2733_v35 = vunpack.i.l.bf16 %v3909_v45  ;;  %v2737_v43 = vpop.permute.xlu0 %2736  ;;  %v2759_v30 = vunpack.i.h.bf16 %v3911_v47  ;;  %v2758_v56 = vunpack.i.l.bf16 %v3911_v47 }
 0x221   : > { %v2739_v15 = vunpack.i.h.bf16 %v2737_v43  ;;  %v2738_v34 = vunpack.i.l.bf16 %v2737_v43 }
 0x222   : > { %v1466_v59 = vsel %vm941_vm8, %v2729_v44, %v2733_v35  ;;  %v1467_v42 = vsel %vm941_vm8, %v2733_v35, %v2734_v36  ;;  %v1492_v8 = vsel %vm941_vm8, %v2718_v0, %v2759_v30  ;;  %v581_v35 = vmul.f32 %v3158_v18, %v3272_v4 }
 0x223   : > { %1584 = vmatpush.msra.mxu2 %v1466_v59  ;;  %1604 = vmatpush.msra.mxu3 %v1467_v42  ;;  %v1458_v58 = vsel %vm941_vm8, %v2738_v34, %v2739_v15  ;;  %v4590_v18 = vpack.i.bf16 %v3494_v50, %v3511_v28  ;;  %v2240_v28 = vld [vmem:[%s4563_s8 + $0x8] sm:$0xff] }
 0x224   : > { %1621 = vmatpush.msra.mxu0 %v1492_v8  ;;  %2881 = vrot.lane.b32.xlu1 %v2880_v23, %s2940_s26 }
 0x225   : > { %1585 = vmatpush.msra.mxu2 %v1458_v58 }
 0x227   : > { %v3929_v22 = vpop.permute.xlu1 %2741  ;;  %v3931_v63 = vpop.permute.xlu2 %2766 }
 0x228   : > { %v2744_v26 = vunpack.i.h.bf16 %v3929_v22  ;;  %v2743_v3 = vunpack.i.l.bf16 %v3929_v22  ;;  %v3935_v20 = vpop.permute.xlu0 %2746  ;;  %v2769_v17 = vunpack.i.h.bf16 %v3931_v63  ;;  %v2768_v1 = vunpack.i.l.bf16 %v3931_v63 }
 0x229   : > { %v2749_v37 = vunpack.i.h.bf16 %v3935_v20  ;;  %v2748_v5 = vunpack.i.l.bf16 %v3935_v20 }
 0x22a   : > { %v1459_v12 = vsel %vm941_vm8, %v2739_v15, %v2743_v3  ;;  %v1435_v31 = vsel %vm941_vm8, %v2768_v1, %v2769_v17  ;;  %v4011_v15 = vld [vmem:[%s4559_s4] sm:$0xff] }
 0x22b   : > { %v1450_v51 = vsel %vm941_vm8, %v2744_v26, %v2748_v5  ;;  %1605 = vmatpush.msra.mxu3 %v1459_v12  ;;  %v1451_v10 = vsel %vm941_vm8, %v2748_v5, %v2749_v37 }
 0x22c   : > { %1586 = vmatpush.msra.mxu2 %v1450_v51  ;;  %2896 = vrot.lane.b32.xlu1 %v2895_v46, %s2940_s26 }
 0x22d   : > { %1606 = vmatpush.msra.mxu3 %v1451_v10 }
 0x22f   : > { %v2752_v29 = vpop.permute.xlu1 %2751  ;;  %v3950_v55 = vpop.permute.xlu2 %2781 }
 0x230   : > { %v2754_v13 = vunpack.i.h.bf16 %v2752_v29  ;;  %v2753_v9 = vunpack.i.l.bf16 %v2752_v29  ;;  %v3954_v54 = vpop.permute.xlu0 %2761  ;;  %v2784_v39 = vunpack.i.h.bf16 %v3950_v55  ;;  %v2783_v40 = vunpack.i.l.bf16 %v3950_v55 }
 0x231   : > { %v2764_v48 = vunpack.i.h.bf16 %v3954_v54  ;;  %v2763_v6 = vunpack.i.l.bf16 %v3954_v54 }
 0x232   : > { %v1442_v41 = vsel %vm941_vm8, %v2753_v9, %v2754_v13  ;;  %v1443_v49 = vsel %vm941_vm8, %v2754_v13, %v2758_v56  ;;  %v1476_v11 = vsel %vm941_vm8, %v2728_v53, %v2784_v39 }
 0x233   : > { %1587 = vmatpush.msra.mxu2 %v1442_v41  ;;  %1607 = vmatpush.msra.mxu3 %v1443_v49  ;;  %v1493_v0 = vsel %vm941_vm8, %v2759_v30, %v2763_v6  ;;  %v1434_v33 = vsel %vm941_vm8, %v2764_v48, %v2768_v1 }
 0x234   : > { %1641 = vmatpush.msra.mxu1 %v1493_v0  ;;  %1252 = vperm.xlu1 %2905, %v1249_v32  }
 0x235   : > { %1588 = vmatpush.msra.mxu2 %v1434_v33  ;;  %1608 = vmatpush.msra.mxu3 %v1435_v31 }
 0x237   : > { %v1064_v62 = vpop.permute.xlu1 %1063  ;;  %v3969_v38 = vpop.permute.xlu2 %2796 }
 0x238   : > { %v1072_v57 = vsel %vm611_vm2, %v2704_v21, %v1064_v62  ;;  %v2890_v14 = vpack.i.bf16 %v3578_v16, %v1064_v62  ;;  %v3975_v52 = vpop.permute.xlu0 %2771  ;;  %v2799_v45 = vunpack.i.h.bf16 %v3969_v38  ;;  %v2798_v42 = vunpack.i.l.bf16 %v3969_v38 }
 0x239   : > { %v2885_v60 = vpack.i.bf16 %v1072_v57, %v2699_v24  ;;  %v2774_v27 = vunpack.i.h.bf16 %v3975_v52  ;;  %v2773_v19 = vunpack.i.l.bf16 %v3975_v52 }
 0x23a   : > { %2891 = vrot.lane.b32.xlu0 %v2890_v14, %s2940_s26  ;;  %v1452_v12 = vsel %vm941_vm8, %v2749_v37, %v2799_v45 }
 0x23b   : > { %2886 = vrot.lane.b32.xlu2 %v2885_v60, %s2940_s26  ;;  %v1484_v7 = vsel %vm941_vm8, %v2724_v25, %v2773_v19  ;;  %v1485_v16 = vsel %vm941_vm8, %v2773_v19, %v2774_v27 }
 0x23c   : > { %1622 = vmatpush.msra.mxu0 %v1484_v7  ;;  %1642 = vmatpush.msra.mxu1 %v1485_v16 }
 0x23e   : > { %1623 = vmatpush.msra.mxu0 %v1476_v11 }
 0x23f   : > { %v3993_v21 = vpop.permute.xlu2 %2811  ;;  %v2777_v24 = vpop.permute.xlu1 %2776 }
 0x240   : > { %v3996_v44 = vpop.permute.xlu0 %2786  ;;  %v2779_v2 = vunpack.i.h.bf16 %v2777_v24  ;;  %v2778_v25 = vunpack.i.l.bf16 %v2777_v24  ;;  %v2814_v20 = vunpack.i.h.bf16 %v3993_v21 }
 0x241   : > { %v2789_v43 = vunpack.i.h.bf16 %v3996_v44  ;;  %v2788_v30 = vunpack.i.l.bf16 %v3996_v44 }
 0x242   : > { %1280 = vrot.lane.b32.xlu0 %v581_v35, %s2940_s26  ;;  %v1426_v53 = vsel %vm941_vm8, %v2778_v25, %v2779_v2  ;;  %v1427_v61 = vsel %vm941_vm8, %v2779_v2, %v2783_v40  ;;  %v1428_v49 = vsel %vm941_vm8, %v2783_v40, %v2814_v20 }
 0x243   : > { %2901 = vrot.lane.b32.xlu2 %v4590_v18, %s2940_s26  ;;  %1589 = vmatpush.msra.mxu2 %v1426_v53  ;;  %v1468_v4 = vsel %vm941_vm8, %v2734_v36, %v2789_v43  ;;  %v1477_v34 = vsel %vm941_vm8, %v2784_v39, %v2788_v30  ;;  %s4442_s26 = scalar_lea.vmem %s4564_s9, %s2520_s23 }
 0x244   : > { %1609 = vmatpush.msra.mxu3 %v1427_v61  ;;  %1624 = vmatpush.msra.mxu0 %v1468_v4 }
 0x245   : > { %1643 = vmatpush.msra.mxu1 %v1477_v34  ;;  %2445 = vmatmul.msk.f32.vlgmr.msra.gmra.mxu2 %vm1570_vm14, %v4011_v15 }
 0x246   : > { %2446 = vmatmul.msk.f32.vlgmr.msra.gmra.mxu3 %vm1570_vm14, %v4011_v15 }
 0x247   : > { %v4027_v50 = vpop.permute.xlu1 %2791  ;;  %v4038_v8 = vpop.permute.xlu2 %2826 }
 0x248   : > { %v4033_v36 = vpop.permute.xlu0 %2801  ;;  %v2794_v23 = vunpack.i.h.bf16 %v4027_v50  ;;  %v2793_v59 = vunpack.i.l.bf16 %v4027_v50  ;;  %v2829_v54 = vunpack.i.h.bf16 %v4038_v8  ;;  %v2828_v62 = vunpack.i.l.bf16 %v4038_v8 }
 0x249   : > { %v2804_v58 = vunpack.i.h.bf16 %v4033_v36  ;;  %v2803_v26 = vunpack.i.l.bf16 %v4033_v36 }
 0x24a   : > { %2250 = vperm.xlu0 %2544, %v2240_v28   ;;  %v1460_v5 = vsel %vm941_vm8, %v2743_v3, %v2794_v23  ;;  %v1469_v46 = vsel %vm941_vm8, %v2789_v43, %v2793_v59  ;;  %v1461_v51 = vsel %vm941_vm8, %v2794_v23, %v2798_v42  ;;  %v1478_v19 = vsel %vm941_vm8, %v2788_v30, %v2829_v54 }
 0x24b   : > { %1625 = vmatpush.msra.mxu0 %v1460_v5  ;;  %1644 = vmatpush.msra.mxu1 %v1469_v46  ;;  %v1444_v22 = vsel %vm941_vm8, %v2758_v56, %v2804_v58  ;;  %v1453_v3 = vsel %vm941_vm8, %v2799_v45, %v2803_v26  ;;  %v2813_v56 = vunpack.i.l.bf16 %v3993_v21 }
 0x24d   : > { %1626 = vmatpush.msra.mxu0 %v1452_v12  ;;  %1645 = vmatpush.msra.mxu1 %v1461_v51 }
 0x24f   : > { %v4058_v10 = vpop.permute.xlu1 %2806  ;;  %1627 = vmatpush.msra.mxu0 %v1444_v22  ;;  %1646 = vmatpush.msra.mxu1 %v1453_v3  ;;  %v4072_v48 = vpop.permute.xlu2 %2841  ;;  %v2241_v22 = vld [vmem:[%s4563_s8 + $0x10] sm:$0xff] }
 0x250   : > { %v4061_v37 = vpop.permute.xlu0 %2816  ;;  %v2809_v29 = vunpack.i.h.bf16 %v4058_v10  ;;  %v2808_v55 = vunpack.i.l.bf16 %v4058_v10  ;;  %v2843_v25 = vunpack.i.l.bf16 %v4072_v48  ;;  %2255 = vperm.xlu1 %2905, %v2241_v22  }
 0x251   : > { %v2819_v47 = vunpack.i.h.bf16 %v4061_v37  ;;  %v2818_v1 = vunpack.i.l.bf16 %v4061_v37 }
 0x252   : > { %v1436_v13 = vsel %vm941_vm8, %v2769_v17, %v2809_v29  ;;  %v1445_v9 = vsel %vm941_vm8, %v2804_v58, %v2808_v55  ;;  %v1437_v0 = vsel %vm941_vm8, %v2809_v29, %v2813_v56 }
 0x253   : > { %1628 = vmatpush.msra.mxu0 %v1436_v13  ;;  %1647 = vmatpush.msra.mxu1 %v1445_v9  ;;  %v1494_v41 = vsel %vm941_vm8, %v2763_v6, %v2819_v47  ;;  %v1429_v63 = vsel %vm941_vm8, %v2814_v20, %v2818_v1 }
 0x254   : > { %1661 = vmatpush.msrb.mxu2 %v1494_v41 }
 0x255   : > { %1629 = vmatpush.msra.mxu0 %v1428_v49  ;;  %1648 = vmatpush.msra.mxu1 %v1437_v0  ;;  %v2908_v0 = vld [vmem:[%s3025_s21 + $0x48] sm:$0xff] }
 0x256   : > { %2447 = vmatmul.msk.f32.vlgmr.msra.gmra.mxu0 %vm1570_vm14, %v4011_v15 }
 0x257   : > { %v2822_v17 = vpop.permute.xlu1 %2821  ;;  %1649 = vmatpush.msra.mxu1 %v1429_v63  ;;  %v2857_v16 = vpop.permute.xlu2 %2856 }
 0x258   : > { %v4087_v6 = vpop.permute.xlu0 %2831  ;;  %v2824_v33 = vunpack.i.h.bf16 %v2822_v17  ;;  %v2823_v31 = vunpack.i.l.bf16 %v2822_v17  ;;  %2448 = vmatmul.msk.f32.vlgmr.msra.gmra.mxu1 %vm1570_vm14, %v4011_v15  ;;  %v2859_v53 = vunpack.i.h.bf16 %v2857_v16  ;;  %v2858_v28 = vunpack.i.l.bf16 %v2857_v16  ;;  %v2909_v17 = vld [vmem:[%s3025_s21] sm:$0xff] }
 0x259   : > { %v2834_v57 = vunpack.i.h.bf16 %v4087_v6  ;;  %v2833_v14 = vunpack.i.l.bf16 %v4087_v6  ;;  %v2910_v6 = vld [vmem:[%s3025_s21 + $0x8] sm:$0xff] }
 0x25a   : > { %v1486_v39 = vsel %vm941_vm8, %v2774_v27, %v2824_v33  ;;  %v1495_v60 = vsel %vm941_vm8, %v2819_v47, %v2823_v31  ;;  %v1487_v7 = vsel %vm941_vm8, %v2824_v33, %v2828_v62  ;;  %v2844_v27 = vunpack.i.h.bf16 %v4072_v48  ;;  %v2911_v33 = vld [vmem:[%s3025_s21 + $0x60] sm:$0xff] }
 0x25b   : > { %1662 = vmatpush.msrb.mxu2 %v1486_v39  ;;  %1681 = vmatpush.msrb.mxu3 %v1495_v60  ;;  %v1470_v11 = vsel %vm941_vm8, %v2793_v59, %v2834_v57  ;;  %v1479_v24 = vsel %vm941_vm8, %v2829_v54, %v2833_v14  ;;  %v1438_v59 = vsel %vm941_vm8, %v2813_v56, %v2859_v53  ;;  %v2912_v39 = vld [vmem:[%s3025_s21 + $0x68] sm:$0xff]  ;;  %v4174_v60 = vld [vmem:[%s4562_s7] sm:$0xff] }
 0x25c   : > { %v1454_v61 = vsel %vm941_vm8, %v2803_v26, %v2844_v27 }
 0x25d   : > { %1663 = vmatpush.msrb.mxu2 %v1478_v19  ;;  %1682 = vmatpush.msrb.mxu3 %v1487_v7  ;;  %v2913_v19 = vld [vmem:[%s3025_s21 + $0x20] sm:$0xff] }
 0x25f   : > { %v2837_v52 = vpop.permute.xlu1 %2836  ;;  %1664 = vmatpush.msrb.mxu2 %v1470_v11  ;;  %1683 = vmatpush.msrb.mxu3 %v1479_v24  ;;  %v4124_v34 = vpop.permute.xlu2 %2871  ;;  %v2914_v11 = vld [vmem:[%s3025_s21 + $0x28] sm:$0xff] }
 0x260   : > { %v4105_v40 = vpop.permute.xlu0 %2846  ;;  %v2839_v2 = vunpack.i.h.bf16 %v2837_v52  ;;  %v2838_v44 = vunpack.i.l.bf16 %v2837_v52  ;;  %v2874_v58 = vunpack.i.h.bf16 %v4124_v34  ;;  %v4193_v52 = vld [vmem:[%s4562_s7 + $0x8] sm:$0xff] }
 0x261   : > { %v2849_v35 = vunpack.i.h.bf16 %v4105_v40  ;;  %v2848_v43 = vunpack.i.l.bf16 %v4105_v40 }
 0x262   : > { %v1462_v30 = vsel %vm941_vm8, %v2798_v42, %v2839_v2  ;;  %v1471_v32 = vsel %vm941_vm8, %v2834_v57, %v2838_v44  ;;  %v1463_v18 = vsel %vm941_vm8, %v2839_v2, %v2843_v25  ;;  %v1480_v51 = vsel %vm941_vm8, %v2833_v14, %v2874_v58 }
 0x263   : > { %1665 = vmatpush.msrb.mxu2 %v1462_v30  ;;  %1684 = vmatpush.msrb.mxu3 %v1471_v32  ;;  %v1446_v4 = vsel %vm941_vm8, %v2808_v55, %v2849_v35  ;;  %v1455_v38 = vsel %vm941_vm8, %v2844_v27, %v2848_v43  ;;  %v2873_v55 = vunpack.i.l.bf16 %v4124_v34  ;;  %v4202_v27 = vld [vmem:[%s4562_s7 + $0x10] sm:$0xff] }
 0x264   : > { %v2916_v34 = vld [vmem:[%s3025_s21 + $0x10] sm:$0xff] }
 0x265   : > { %1666 = vmatpush.msrb.mxu2 %v1454_v61  ;;  %1685 = vmatpush.msrb.mxu3 %v1463_v18 }
 0x267   : > { %v4126_v50 = vpop.permute.xlu1 %2851  ;;  %1667 = vmatpush.msrb.mxu2 %v1446_v4  ;;  %1686 = vmatpush.msrb.mxu3 %v1455_v38  ;;  %v4215_v4 = vld [vmem:[%s4562_s7 + $0x18] sm:$0xff] }
 0x268   : > { %v4128_v45 = vpop.permute.xlu0 %2861  ;;  %v2854_v36 = vunpack.i.h.bf16 %v4126_v50  ;;  %v2853_v23 = vunpack.i.l.bf16 %v4126_v50 }
 0x269   : > { %v2864_v42 = vunpack.i.h.bf16 %v4128_v45  ;;  %v2863_v8 = vunpack.i.l.bf16 %v4128_v45  ;;  %1668 = vmatpush.msrb.mxu2 %v1438_v59  ;;  %v2915_v59 = vld [vmem:[%s3025_s21 + $0x50] sm:$0xff] }
 0x26a   : > { %v1447_v26 = vsel %vm941_vm8, %v2849_v35, %v2853_v23  ;;  %v1496_v5 = vsel %vm941_vm8, %v2823_v31, %v2854_v36  ;;  %v1497_v46 = vsel %vm941_vm8, %v2854_v36, %v2858_v28 }
 0x26b   : > { %1687 = vmatpush.msrb.mxu3 %v1447_v26  ;;  %1701 = vmatpush.msrb.mxu0 %v1496_v5  ;;  %v1439_v21 = vsel %vm941_vm8, %v2859_v53, %v2863_v8  ;;  %v1488_v12 = vsel %vm941_vm8, %v2828_v62, %v2864_v42  ;;  %v2920_v26 = vld [vmem:[%s3025_s21 + $0x30] sm:$0xff]  ;;  %v2921_v5 = vld [vmem:[%s3025_s21 + $0x78] sm:$0xff] }
 0x26c   : > { %1721 = vmatpush.msrb.mxu1 %v1497_v46 }
 0x26d   : > { %1688 = vmatpush.msrb.mxu3 %v1439_v21  ;;  %1702 = vmatpush.msrb.mxu0 %v1488_v12 }
 0x26f   : > { %1703 = vmatpush.msrb.mxu0 %v1480_v51 }
 0x286   : > { %v2877_v3 = vpop.permute.xlu0 %2876 }
 0x287   : > { %v2879_v10 = vunpack.i.h.bf16 %v2877_v3  ;;  %v2878_v13 = vunpack.i.l.bf16 %v2877_v3 }
 0x289   : > { %v1472_v20 = vsel %vm941_vm8, %v2838_v44, %v2879_v10  ;;  %v1481_v37 = vsel %vm941_vm8, %v2874_v58, %v2878_v13  ;;  %v2919_v58 = vld [vmem:[%s3025_s21 + $0x18] sm:$0xff] }
 0x28a   : > { %1704 = vmatpush.msrb.mxu0 %v1472_v20 }
 0x28d   : > { %v2867_v29 = vpop.permute.xlu1 %2866 }
 0x28e   : > { %v2869_v47 = vunpack.i.h.bf16 %v2867_v29  ;;  %v2868_v56 = vunpack.i.l.bf16 %v2867_v29 }
 0x290   : > { %v1430_v9 = vsel %vm941_vm8, %v2818_v1, %v2869_v47  ;;  %v1431_v41 = vsel %vm941_vm8, %v2869_v47, %v2873_v55  ;;  %v1489_v49 = vsel %vm941_vm8, %v2864_v42, %v2868_v56  ;;  %v2907_v1 = vld [vmem:[%s3025_s21 + $0x40] sm:$0xff]  ;;  %v2917_v42 = vld [vmem:[%s3025_s21 + $0x58] sm:$0xff] }
 0x291   : > { %1669 = vmatpush.msrb.mxu2 %v1430_v9  ;;  %1689 = vmatpush.msrb.mxu3 %v1431_v41  ;;  %v4282_v47 = vld [vmem:[%s4561_s6] sm:$0xff]  ;;  %v4296_v41 = vld [vmem:[%s4561_s6 + $0x8] sm:$0xff] }
 0x292   : > { %1722 = vmatpush.msrb.mxu1 %v1489_v49  ;;  %2449 = vmatmul.msk.f32.vlgmr.msrb.gmra.mxu2 %vm1570_vm14, %v4011_v15  ;;  %v2239_v49 = vld [vmem:[%s4563_s8] sm:$0xff] }
 0x293   : > { %2450 = vmatmul.msk.f32.vlgmr.msrb.gmra.mxu3 %vm1570_vm14, %v4011_v15  ;;  %1776 = vmatpush.msra.mxu2 %v2907_v1  ;;  %v4325_v1 = vld [vmem:[%s4561_s6 + $0x18] sm:$0xff] }
 0x294   : > { %1723 = vmatpush.msrb.mxu1 %v1481_v37  ;;  %1805 = vmatpush.msra.mxu3 %v2908_v0  ;;  %v4312_v37 = vld [vmem:[%s4561_s6 + $0x10] sm:$0xff]  ;;  %v2242_v0 = vld [vmem:[%s4563_s8 + $0x18] sm:$0xff] }
 0x295   : > { %v2887_v63 = vpop.permute.xlu2 %2886  ;;  %1777 = vmatpush.msra.mxu2 %v2909_v17  ;;  %2245 = vperm.xlu2 %2906, %v2239_v49  }
 0x296   : > { %v2882_v54 = vpop.permute.xlu1 %2881  ;;  %1806 = vmatpush.msra.mxu3 %v2910_v6  ;;  %v2889_v31 = vunpack.i.h.bf16 %v2887_v63  ;;  %v2888_v62 = vunpack.i.l.bf16 %v2887_v63 }
 0x297   : > { %1892 = vmatpush.msrb.mxu2 %v2911_v33  ;;  %v2884_v57 = vunpack.i.h.bf16 %v2882_v54  ;;  %v2883_v14 = vunpack.i.l.bf16 %v2882_v54 }
 0x298   : > { %1921 = vmatpush.msrb.mxu3 %v2912_v39  ;;  %v1456_v24 = vsel %vm941_vm8, %v2848_v43, %v2889_v31 }
 0x299   : > { %1893 = vmatpush.msrb.mxu2 %v2913_v19  ;;  %v1464_v7 = vsel %vm941_vm8, %v2843_v25, %v2884_v57  ;;  %v1473_v16 = vsel %vm941_vm8, %v2879_v10, %v2883_v14  ;;  %v1465_v48 = vsel %vm941_vm8, %v2884_v57, %v2888_v62 }
 0x29a   : > { %1922 = vmatpush.msrb.mxu3 %v2914_v11  ;;  %1705 = vmatpush.msrb.mxu0 %v1464_v7 }
 0x29b   : > { %1724 = vmatpush.msrb.mxu1 %v1473_v16  ;;  %2453 = vmatmul.msk.f32.vlgmr.msra.gmra.mxu2 %vm886_vm7, %v4174_v60 }
 0x29c   : > { %2457 = vmatmul.msk.f32.vlgmr.msra.gmra.mxu3 %vm886_vm7, %v4174_v60  ;;  %1706 = vmatpush.msrb.mxu0 %v1456_v24 }
 0x29d   : > { %1725 = vmatpush.msrb.mxu1 %v1465_v48  ;;  %v2902_v2 = vpop.permute.xlu2 %2901  ;;  %2260 = vperm.xlu2 %2906, %v2242_v0  }
 0x29e   : > { %v2897_v40 = vpop.permute.xlu1 %2896  ;;  %v2904_v30 = vunpack.i.h.bf16 %v2902_v2  ;;  %v2903_v32 = vunpack.i.l.bf16 %v2902_v2 }
 0x29f   : > { %v2899_v25 = vunpack.i.h.bf16 %v2897_v40  ;;  %v2898_v53 = vunpack.i.l.bf16 %v2897_v40 }
 0x2a0   : > { %v1432_v50 = vsel %vm941_vm8, %v2873_v55, %v2904_v30 }
 0x2a1   : > { %v1440_v38 = vsel %vm941_vm8, %v2863_v8, %v2899_v25  ;;  %v1441_v45 = vsel %vm941_vm8, %v2899_v25, %v2903_v32  ;;  %v2918_v8 = vld [vmem:[%s3025_s21 + $0x70] sm:$0xff] }
 0x2a3   : > { %2454 = vmatmul.msk.f32.gmra.mxu2 %vm886_vm7, %v4193_v52 }
 0x2a4   : > { %2458 = vmatmul.msk.f32.gmra.mxu3 %vm886_vm7, %v4193_v52 }
 0x2a6   : > { %v4256_v46 = vpop.permute.xlu1 %1252 }
 0x2ab   : > { %2455 = vmatmul.msk.f32.gmra.mxu2 %vm886_vm7, %v4202_v27 }
 0x2ac   : > { %2459 = vmatmul.msk.f32.gmra.mxu3 %vm886_vm7, %v4202_v27  ;;  %v2892_v44 = vpop.permute.xlu0 %2891 }
 0x2ad   : > { %v2894_v35 = vunpack.i.h.bf16 %v2892_v44  ;;  %v2893_v43 = vunpack.i.l.bf16 %v2892_v44 }
 0x2af   : > { %v1448_v61 = vsel %vm941_vm8, %v2853_v23, %v2894_v35  ;;  %v1457_v18 = vsel %vm941_vm8, %v2889_v31, %v2893_v43  ;;  %v1449_v28 = vsel %vm941_vm8, %v2894_v35, %v2898_v53 }
 0x2b0   : > { %1707 = vmatpush.msrb.mxu0 %v1448_v61  ;;  %1726 = vmatpush.msrb.mxu1 %v1457_v18 }
 0x2b2   : > { %1708 = vmatpush.msrb.mxu0 %v1440_v38  ;;  %1727 = vmatpush.msrb.mxu1 %v1449_v28 }
 0x2b3   : > { %2456 = vmatmul.msk.f32.gmra.mxu2 %vm886_vm7, %v4215_v4 }
 0x2b4   : > { %2460 = vmatmul.msk.f32.gmra.mxu3 %vm886_vm7, %v4215_v4  ;;  %v1281_v36 = vpop.permute.xlu0 %1280  ;;  %1709 = vmatpush.msrb.mxu0 %v1432_v50 }
 0x2b5   : > { %1728 = vmatpush.msrb.mxu1 %v1441_v45  ;;  %2451 = vmatmul.msk.f32.vlgmr.msrb.gmra.mxu0 %vm1570_vm14, %v4011_v15  ;;  %v1433_v23 = vsel %vm941_vm8, %v2904_v30, %v1281_v36 }
 0x2b6   : > { %1834 = vmatpush.msra.mxu0 %v2915_v59 }
 0x2b7   : > { %1729 = vmatpush.msrb.mxu1 %v1433_v23 }
 0x2b8   : > { %2452 = vmatmul.msk.f32.vlgmr.msrb.gmra.mxu1 %vm1570_vm14, %v4011_v15  ;;  %1835 = vmatpush.msra.mxu0 %v2916_v34  ;;  %v2922_v15 = vld [vmem:[%s3025_s21 + $0x38] sm:$0xff] }
 0x2b9   : > { %1863 = vmatpush.msra.mxu1 %v2917_v42 }
 0x2ba   : > { %1950 = vmatpush.msrb.mxu0 %v2918_v8 }
 0x2bb   : > { %1864 = vmatpush.msra.mxu1 %v2919_v58  ;;  %2469 = vmatmul.msk.f32.vlgmr.msrb.gmra.mxu2 %vm886_vm7, %v4174_v60 }
 0x2bc   : > { %2473 = vmatmul.msk.f32.vlgmr.msrb.gmra.mxu3 %vm886_vm7, %v4174_v60  ;;  %1951 = vmatpush.msrb.mxu0 %v2920_v26 }
 0x2bd   : > { %1979 = vmatpush.msrb.mxu1 %v2921_v5  ;;  %2461 = vmatmul.msk.f32.vlgmr.msra.gmra.mxu0 %vm886_vm7, %v4174_v60 }
 0x2bf   : > { %1980 = vmatpush.msrb.mxu1 %v2922_v15 }
 0x2c0   : > { %2465 = vmatmul.msk.f32.vlgmr.msra.gmra.mxu1 %vm886_vm7, %v4174_v60 }
 0x2c3   : > { %2470 = vmatmul.msk.f32.gmra.mxu2 %vm886_vm7, %v4193_v52 }
 0x2c4   : > { %2474 = vmatmul.msk.f32.gmra.mxu3 %vm886_vm7, %v4193_v52 }
 0x2c5   : > { %2462 = vmatmul.msk.f32.gmra.mxu0 %vm886_vm7, %v4193_v52 }
 0x2c8   : > { %2466 = vmatmul.msk.f32.gmra.mxu1 %vm886_vm7, %v4193_v52  ;;  %v1591_v21 = vpop.f32.mrf.mxu2 }
 0x2c9   : > { %v1592_v12 = vadd.f32 %v1591_v21, %v4256_v46  ;;  %v1611_v51 = vpop.f32.mrf.mxu3 }
 0x2ca   : > { %v1612_v22 = vadd.f32 %v1611_v51, %v4256_v46 }
 0x2cb   : > { %2471 = vmatmul.msk.f32.gmra.mxu2 %vm886_vm7, %v4202_v27  ;;  %v1734_v3 = vmax.f32 %v1592_v12, 0.0 }
 0x2cc   : > { %2475 = vmatmul.msk.f32.gmra.mxu3 %vm886_vm7, %v4202_v27  ;;  %v1735_v10 = vmax.f32 %v1612_v22, 0.0 }
 0x2cd   : > { %2463 = vmatmul.msk.f32.gmra.mxu0 %vm886_vm7, %v4202_v27  ;;  %2022 = vmatpush.msra.mxu2 %v1734_v3 }
 0x2ce   : > { %2051 = vmatpush.msra.mxu3 %v1735_v10 }
 0x2d0   : > { %2467 = vmatmul.msk.f32.gmra.mxu1 %vm886_vm7, %v4202_v27 }
 0x2d3   : > { %2472 = vmatmul.msk.f32.gmra.mxu2 %vm886_vm7, %v4215_v4  ;;  %v1631_v20 = vpop.f32.mrf.mxu0 }
 0x2d4   : > { %2476 = vmatmul.msk.f32.gmra.mxu3 %vm886_vm7, %v4215_v4  ;;  %v1632_v29 = vadd.f32 %v1631_v20, %v4256_v46 }
 0x2d5   : > { %2464 = vmatmul.msk.f32.gmra.mxu0 %vm886_vm7, %v4215_v4  ;;  %v1651_v55 = vpop.f32.mrf.mxu1 }
 0x2d6   : > { %v1736_v56 = vmax.f32 %v1632_v29, 0.0  ;;  %v1652_v13 = vadd.f32 %v1651_v55, %v4256_v46  ;;  %v4450_v29 = vpop.permute.xlu0 %2250 }
 0x2d8   : > { %2468 = vmatmul.msk.f32.gmra.mxu1 %vm886_vm7, %v4215_v4  ;;  %v1737_v9 = vmax.f32 %v1652_v13, 0.0  ;;  %2080 = vmatpush.msra.mxu0 %v1736_v56 }
 0x2da   : > { %2109 = vmatpush.msra.mxu1 %v1737_v9 }
 0x2db   : > { %2485 = vmatmul.msk.f32.vlgmr.msra.gmra.mxu2 %vm1994_vm15, %v4282_v47 }
 0x2dc   : > { %2489 = vmatmul.msk.f32.vlgmr.msra.gmra.mxu3 %vm1994_vm15, %v4282_v47 }
 0x2dd   : > { %2477 = vmatmul.msk.f32.vlgmr.msrb.gmra.mxu0 %vm886_vm7, %v4174_v60 }
 0x2e0   : > { %2481 = vmatmul.msk.f32.vlgmr.msrb.gmra.mxu1 %vm886_vm7, %v4174_v60 }
 0x2e3   : > { %2486 = vmatmul.msk.f32.gmra.mxu2 %vm1994_vm15, %v4296_v41 }
 0x2e4   : > { %2490 = vmatmul.msk.f32.gmra.mxu3 %vm1994_vm15, %v4296_v41 }
 0x2e5   : > { %2478 = vmatmul.msk.f32.gmra.mxu0 %vm886_vm7, %v4193_v52 }
 0x2e8   : > { %2482 = vmatmul.msk.f32.gmra.mxu1 %vm886_vm7, %v4193_v52 }
 0x2eb   : > { %2487 = vmatmul.msk.f32.gmra.mxu2 %vm1994_vm15, %v4312_v37 }
 0x2ec   : > { %2491 = vmatmul.msk.f32.gmra.mxu3 %vm1994_vm15, %v4312_v37 }
 0x2ed   : > { %2479 = vmatmul.msk.f32.gmra.mxu0 %vm886_vm7, %v4202_v27 }
 0x2ef   : > { %v4434_v34 = vpop.permute.xlu2 %2245 }
 0x2f0   : > { %2483 = vmatmul.msk.f32.gmra.mxu1 %vm886_vm7, %v4202_v27 }
 0x2f3   : > { %2488 = vmatmul.msk.f32.gmra.mxu2 %vm1994_vm15, %v4325_v1 }
 0x2f4   : > { %2492 = vmatmul.msk.f32.gmra.mxu3 %vm1994_vm15, %v4325_v1 }
 0x2f5   : > { %2480 = vmatmul.msk.f32.gmra.mxu0 %vm886_vm7, %v4215_v4 }
 0x2f8   : > { %2484 = vmatmul.msk.f32.gmra.mxu1 %vm886_vm7, %v4215_v4 }
 0x2fd   : > { %2493 = vmatmul.msk.f32.vlgmr.msra.gmra.mxu0 %vm1994_vm15, %v4282_v47 }
 0x300   : > { %2497 = vmatmul.msk.f32.vlgmr.msra.gmra.mxu1 %vm1994_vm15, %v4282_v47 }
 0x305   : > { %2494 = vmatmul.msk.f32.gmra.mxu0 %vm1994_vm15, %v4296_v41 }
 0x308   : > { %2498 = vmatmul.msk.f32.gmra.mxu1 %vm1994_vm15, %v4296_v41 }
 0x30d   : > { %2495 = vmatmul.msk.f32.gmra.mxu0 %vm1994_vm15, %v4312_v37 }
 0x310   : > { %2499 = vmatmul.msk.f32.gmra.mxu1 %vm1994_vm15, %v4312_v37 }
 0x315   : > { %v1671_v63 = vpop.f32.mrf.mxu2  ;;  %2496 = vmatmul.msk.f32.gmra.mxu0 %vm1994_vm15, %v4325_v1 }
 0x316   : > { %v1672_v17 = vadd.f32 %v1671_v63, %v4256_v46  ;;  %v1691_v54 = vpop.f32.mrf.mxu3  ;;  %v4462_v63 = vpop.permute.xlu1 %2255 }
 0x317   : > { %v1692_v6 = vadd.f32 %v1691_v54, %v4256_v46 }
 0x318   : > { %2500 = vmatmul.msk.f32.gmra.mxu1 %vm1994_vm15, %v4325_v1  ;;  %v1738_v33 = vmax.f32 %v1672_v17, 0.0 }
 0x319   : > { %v1739_v31 = vmax.f32 %v1692_v6, 0.0 }
 0x31a   : > { %2138 = vmatpush.msrb.mxu2 %v1738_v33 }
 0x31b   : > { %2167 = vmatpush.msrb.mxu3 %v1739_v31  ;;  %2501 = vmatmul.msk.f32.vlgmr.msrb.gmra.mxu2 %vm1994_vm15, %v4282_v47 }
 0x31c   : > { %2505 = vmatmul.msk.f32.vlgmr.msrb.gmra.mxu3 %vm1994_vm15, %v4282_v47 }
 0x31e   : > { %v1779_v62 = vpop.f32.mrf.mxu2 }
 0x31f   : > { %v1808_v57 = vpop.f32.mrf.mxu3 }
 0x323   : > { %2502 = vmatmul.msk.f32.gmra.mxu2 %vm1994_vm15, %v4296_v41 }
 0x324   : > { %2506 = vmatmul.msk.f32.gmra.mxu3 %vm1994_vm15, %v4296_v41 }
 0x326   : > { %v1782_v14 = vpop.f32.mrf.mxu2 }
 0x327   : > { %v1811_v39 = vpop.f32.mrf.mxu3 }
 0x32b   : > { %2503 = vmatmul.msk.f32.gmra.mxu2 %vm1994_vm15, %v4312_v37 }
 0x32c   : > { %2507 = vmatmul.msk.f32.gmra.mxu3 %vm1994_vm15, %v4312_v37 }
 0x32e   : > { %v4368_v60 = vpop.f32.mrf.mxu2 }
 0x32f   : > { %v4370_v19 = vpop.f32.mrf.mxu3 }
 0x332   : > { %v1711_v7 = vpop.f32.mrf.mxu0 }
 0x333   : > { %v1712_v16 = vadd.f32 %v1711_v7, %v4256_v46  ;;  %2504 = vmatmul.msk.f32.gmra.mxu2 %vm1994_vm15, %v4325_v1 }
 0x334   : > { %2508 = vmatmul.msk.f32.gmra.mxu3 %vm1994_vm15, %v4325_v1 }
 0x335   : > { %v1731_v11 = vpop.f32.mrf.mxu1  ;;  %v1740_v24 = vmax.f32 %v1712_v16, 0.0 }
 0x336   : > { %v1732_v48 = vadd.f32 %v1731_v11, %v4256_v46  ;;  %v4378_v52 = vpop.f32.mrf.mxu2 }
 0x337   : > { %v4380_v27 = vpop.f32.mrf.mxu3  ;;  %2196 = vmatpush.msrb.mxu0 %v1740_v24 }
 0x338   : > { %v1741_v40 = vmax.f32 %v1732_v48, 0.0  ;;  %2509 = vmatmul.msk.f32.vlgmr.msrb.gmra.mxu0 %vm1994_vm15, %v4282_v47 }
 0x33a   : > { %2225 = vmatpush.msrb.mxu1 %v1741_v40  ;;  %v4384_v2 = vpop.f32.mrf.mxu0 }
 0x33b   : > { %2513 = vmatmul.msk.f32.vlgmr.msrb.gmra.mxu1 %vm1994_vm15, %v4282_v47 }
 0x33d   : > { %v4388_v44 = vpop.f32.mrf.mxu1 }
 0x33e   : > { %v4390_v25 = vpop.f32.mrf.mxu2 }
 0x33f   : > { %v4392_v35 = vpop.f32.mrf.mxu3 }
 0x340   : > { %2510 = vmatmul.msk.f32.gmra.mxu0 %vm1994_vm15, %v4296_v41 }
 0x342   : > { %v4396_v43 = vpop.f32.mrf.mxu0 }
 0x343   : > { %2514 = vmatmul.msk.f32.gmra.mxu1 %vm1994_vm15, %v4296_v41 }
 0x345   : > { %v4400_v30 = vpop.f32.mrf.mxu1 }
 0x346   : > { %v4402_v32 = vpop.f32.mrf.mxu2 }
 0x347   : > { %v4404_v53 = vpop.f32.mrf.mxu3 }
 0x348   : > { %2511 = vmatmul.msk.f32.gmra.mxu0 %vm1994_vm15, %v4312_v37 }
 0x34a   : > { %v4408_v61 = vpop.f32.mrf.mxu0 }
 0x34b   : > { %2515 = vmatmul.msk.f32.gmra.mxu1 %vm1994_vm15, %v4312_v37 }
 0x34d   : > { %v4412_v18 = vpop.f32.mrf.mxu1 }
 0x34e   : > { %v4414_v4 = vpop.f32.mrf.mxu2 }
 0x34f   : > { %v4416_v38 = vpop.f32.mrf.mxu3 }
 0x350   : > { %2512 = vmatmul.msk.f32.gmra.mxu0 %vm1994_vm15, %v4325_v1 }
 0x352   : > { %v4420_v28 = vpop.f32.mrf.mxu0 }
 0x353   : > { %2516 = vmatmul.msk.f32.gmra.mxu1 %vm1994_vm15, %v4325_v1 }
 0x355   : > { %v4424_v50 = vpop.f32.mrf.mxu1 }
 0x356   : > { %v4426_v45 = vpop.f32.mrf.mxu2 }
 0x357   : > { %v4428_v36 = vpop.f32.mrf.mxu3 }
 0x35a   : > { %v4430_v23 = vpop.f32.mrf.mxu0 }
 0x35d   : > { %v4432_v59 = vpop.f32.mrf.mxu1 }
 0x35e   : > { %v2024_v42 = vpop.f32.mrf.mxu2 }
 0x35f   : > { %v2053_v8 = vpop.f32.mrf.mxu3  ;;  %v2025_v58 = vadd.f32 %v2024_v42, %v1779_v62 }
 0x360   : > { %v2054_v26 = vadd.f32 %v2053_v8, %v1808_v57  ;;  %v4471_v57 = vpop.permute.xlu2 %2260 }
 0x361   : > { %v2263_v5 = vadd.f32 %v4434_v34, %v2025_v58 }
 0x362   : > { %v2264_v15 = vadd.f32 %v4434_v34, %v2054_v26  ;;  %v4444_v46 = vpop.f32.mrf.mxu0 }
 0x363   : > { %v2295_v21 = vmax.f32 %v2263_v5, 0.0 }
 0x364   : > { %v2296_v12 = vmax.f32 %v2264_v15, 0.0 }
 0x365   : > { %v4446_v51 = vpop.f32.mrf.mxu1  ;;  %2327 = vst [vmem:[%s4442_s26] sm:$0xff] %v2295_v21 }
 0x366   : > { %v2027_v22 = vpop.f32.mrf.mxu2  ;;  %2328 = vst [vmem:[%s4442_s26 + $0x8] sm:$0xff] %v2296_v12 }
 0x367   : > { %v2056_v3 = vpop.f32.mrf.mxu3  ;;  %v2028_v10 = vadd.f32 %v2027_v22, %v1782_v14 }
 0x368   : > { %v2057_v20 = vadd.f32 %v2056_v3, %v1811_v39 }
 0x369   : > { %v2271_v55 = vadd.f32 %v4450_v29, %v2028_v10 }
 0x36a   : > { %v2272_v47 = vadd.f32 %v4450_v29, %v2057_v20  ;;  %v4454_v56 = vpop.f32.mrf.mxu0 }
 0x36b   : > { %v2303_v13 = vmax.f32 %v2271_v55, 0.0 }
 0x36c   : > { %v2304_v9 = vmax.f32 %v2272_v47, 0.0 }
 0x36d   : > { %v4456_v41 = vpop.f32.mrf.mxu1  ;;  %2335 = vst [vmem:[%s4442_s26 + $0x40] sm:$0xff] %v2303_v13 }
 0x36e   : > { %2336 = vst [vmem:[%s4442_s26 + $0x48] sm:$0xff] %v2304_v9  ;;  %v2030_v49 = vpop.f32.mrf.mxu2 }
 0x36f   : > { %v2059_v37 = vpop.f32.mrf.mxu3  ;;  %v2031_v1 = vadd.f32 %v2030_v49, %v4368_v60 }
 0x370   : > { %v2060_v0 = vadd.f32 %v2059_v37, %v4370_v19 }
 0x371   : > { %v2279_v17 = vadd.f32 %v4462_v63, %v2031_v1 }
 0x372   : > { %v2280_v54 = vadd.f32 %v4462_v63, %v2060_v0  ;;  %v4466_v6 = vpop.f32.mrf.mxu0 }
 0x373   : > { %v2311_v33 = vmax.f32 %v2279_v17, 0.0 }
 0x374   : > { %v2312_v31 = vmax.f32 %v2280_v54, 0.0 }
 0x375   : > { %v4468_v62 = vpop.f32.mrf.mxu1  ;;  %2343 = vst [vmem:[%s4442_s26 + $0x80] sm:$0xff] %v2311_v33 }
 0x376   : > { %2344 = vst [vmem:[%s4442_s26 + $0x88] sm:$0xff] %v2312_v31  ;;  %v2033_v14 = vpop.f32.mrf.mxu2 }
 0x377   : > { %v2062_v39 = vpop.f32.mrf.mxu3  ;;  %v2034_v60 = vadd.f32 %v2033_v14, %v4378_v52 }
 0x378   : > { %v2063_v19 = vadd.f32 %v2062_v39, %v4380_v27 }
 0x379   : > { %v2287_v7 = vadd.f32 %v4471_v57, %v2034_v60 }
 0x37a   : > { %v2288_v16 = vadd.f32 %v4471_v57, %v2063_v19  ;;  %v2082_v11 = vpop.f32.mrf.mxu0 }
 0x37b   : > { %v2083_v24 = vadd.f32 %v2082_v11, %v4384_v2  ;;  %v2319_v48 = vmax.f32 %v2287_v7, 0.0 }
 0x37c   : > { %v2320_v40 = vmax.f32 %v2288_v16, 0.0 }
 0x37d   : > { %v2111_v42 = vpop.f32.mrf.mxu1  ;;  %v2265_v8 = vadd.f32 %v4434_v34, %v2083_v24  ;;  %2351 = vst [vmem:[%s4442_s26 + $0xc0] sm:$0xff] %v2319_v48 }
 0x37e   : > { %v2112_v58 = vadd.f32 %v2111_v42, %v4388_v44  ;;  %2352 = vst [vmem:[%s4442_s26 + $0xc8] sm:$0xff] %v2320_v40 }
 0x37f   : > { %v2297_v52 = vmax.f32 %v2265_v8, 0.0 }
 0x380   : > { %v2266_v27 = vadd.f32 %v4434_v34, %v2112_v58 }
 0x381   : > { %2329 = vst [vmem:[%s4442_s26 + $0x10] sm:$0xff] %v2297_v52 }
 0x382   : > { %v2298_v26 = vmax.f32 %v2266_v27, 0.0  ;;  %v2085_v5 = vpop.f32.mrf.mxu0 }
 0x383   : > { %v2086_v2 = vadd.f32 %v2085_v5, %v4396_v43 }
 0x384   : > { %2330 = vst [vmem:[%s4442_s26 + $0x18] sm:$0xff] %v2298_v26 }
 0x385   : > { %v2114_v15 = vpop.f32.mrf.mxu1  ;;  %v2273_v21 = vadd.f32 %v4450_v29, %v2086_v2 }
 0x386   : > { %v2115_v12 = vadd.f32 %v2114_v15, %v4400_v30 }
 0x387   : > { %v2305_v44 = vmax.f32 %v2273_v21, 0.0 }
 0x388   : > { %v2274_v22 = vadd.f32 %v4450_v29, %v2115_v12 }
 0x389   : > { %2337 = vst [vmem:[%s4442_s26 + $0x50] sm:$0xff] %v2305_v44 }
 0x38a   : > { %v2306_v3 = vmax.f32 %v2274_v22, 0.0  ;;  %v2088_v10 = vpop.f32.mrf.mxu0 }
 0x38b   : > { %v2089_v20 = vadd.f32 %v2088_v10, %v4408_v61 }
 0x38c   : > { %2338 = vst [vmem:[%s4442_s26 + $0x58] sm:$0xff] %v2306_v3 }
 0x38d   : > { %v2117_v55 = vpop.f32.mrf.mxu1  ;;  %v2281_v43 = vadd.f32 %v4462_v63, %v2089_v20 }
 0x38e   : > { %v2118_v47 = vadd.f32 %v2117_v55, %v4412_v18 }
 0x38f   : > { %v2313_v13 = vmax.f32 %v2281_v43, 0.0 }
 0x390   : > { %v2282_v30 = vadd.f32 %v4462_v63, %v2118_v47 }
 0x391   : > { %2345 = vst [vmem:[%s4442_s26 + $0x90] sm:$0xff] %v2313_v13 }
 0x392   : > { %v2314_v9 = vmax.f32 %v2282_v30, 0.0  ;;  %v2091_v49 = vpop.f32.mrf.mxu0 }
 0x393   : > { %v2092_v37 = vadd.f32 %v2091_v49, %v4420_v28 }
 0x394   : > { %2346 = vst [vmem:[%s4442_s26 + $0x98] sm:$0xff] %v2314_v9 }
 0x395   : > { %v2120_v1 = vpop.f32.mrf.mxu1  ;;  %v2289_v61 = vadd.f32 %v4471_v57, %v2092_v37 }
 0x396   : > { %v2121_v0 = vadd.f32 %v2120_v1, %v4424_v50 }
 0x397   : > { %v2321_v17 = vmax.f32 %v2289_v61, 0.0 }
 0x398   : > { %v2290_v54 = vadd.f32 %v4471_v57, %v2121_v0 }
 0x399   : > { %2353 = vst [vmem:[%s4442_s26 + $0xd0] sm:$0xff] %v2321_v17 }
 0x39a   : > { %v2322_v18 = vmax.f32 %v2290_v54, 0.0 }
 0x39c   : > { %2354 = vst [vmem:[%s4442_s26 + $0xd8] sm:$0xff] %v2322_v18 }
 0x39e   : > { %v2140_v33 = vpop.f32.mrf.mxu2 }
 0x39f   : > { %v2141_v31 = vadd.f32 %v2140_v33, %v4390_v25  ;;  %v2169_v14 = vpop.f32.mrf.mxu3 }
 0x3a0   : > { %v2170_v28 = vadd.f32 %v2169_v14, %v4392_v35 }
 0x3a1   : > { %v2267_v39 = vadd.f32 %v4434_v34, %v2141_v31 }
 0x3a2   : > { %v2268_v60 = vadd.f32 %v4434_v34, %v2170_v28 }
 0x3a3   : > { %v2299_v19 = vmax.f32 %v2267_v39, 0.0 }
 0x3a4   : > { %v2300_v50 = vmax.f32 %v2268_v60, 0.0 }
 0x3a5   : > { %2331 = vst [vmem:[%s4442_s26 + $0x20] sm:$0xff] %v2299_v19 }
 0x3a6   : > { %2332 = vst [vmem:[%s4442_s26 + $0x28] sm:$0xff] %v2300_v50  ;;  %v2143_v7 = vpop.f32.mrf.mxu2 }
 0x3a7   : > { %v2144_v16 = vadd.f32 %v2143_v7, %v4402_v32  ;;  %v2172_v11 = vpop.f32.mrf.mxu3 }
 0x3a8   : > { %v2173_v25 = vadd.f32 %v2172_v11, %v4404_v53 }
 0x3a9   : > { %v2275_v24 = vadd.f32 %v4450_v29, %v2144_v16 }
 0x3aa   : > { %v2276_v35 = vadd.f32 %v4450_v29, %v2173_v25 }
 0x3ab   : > { %v2307_v48 = vmax.f32 %v2275_v24, 0.0 }
 0x3ac   : > { %v2308_v40 = vmax.f32 %v2276_v35, 0.0 }
 0x3ad   : > { %2339 = vst [vmem:[%s4442_s26 + $0x60] sm:$0xff] %v2307_v48 }
 0x3ae   : > { %2340 = vst [vmem:[%s4442_s26 + $0x68] sm:$0xff] %v2308_v40  ;;  %v2146_v42 = vpop.f32.mrf.mxu2 }
 0x3af   : > { %v2147_v8 = vadd.f32 %v2146_v42, %v4414_v4  ;;  %v2175_v58 = vpop.f32.mrf.mxu3 }
 0x3b0   : > { %v2176_v52 = vadd.f32 %v2175_v58, %v4416_v38 }
 0x3b1   : > { %v2283_v32 = vadd.f32 %v4462_v63, %v2147_v8 }
 0x3b2   : > { %v2284_v27 = vadd.f32 %v4462_v63, %v2176_v52 }
 0x3b3   : > { %v2315_v53 = vmax.f32 %v2283_v32, 0.0 }
 0x3b4   : > { %v2316_v26 = vmax.f32 %v2284_v27, 0.0 }
 0x3b5   : > { %2347 = vst [vmem:[%s4442_s26 + $0xa0] sm:$0xff] %v2315_v53  ;;  %v2198_v5 = vpop.f32.mrf.mxu0 }
 0x3b6   : > { %2348 = vst [vmem:[%s4442_s26 + $0xa8] sm:$0xff] %v2316_v26  ;;  %v2199_v2 = vadd.f32 %v2198_v5, %v4430_v23  ;;  %v2149_v15 = vpop.f32.mrf.mxu2 }
 0x3b7   : > { %v2150_v21 = vadd.f32 %v2149_v15, %v4426_v45  ;;  %v2178_v4 = vpop.f32.mrf.mxu3 }
 0x3b8   : > { %v2227_v12 = vpop.f32.mrf.mxu1  ;;  %v2269_v38 = vadd.f32 %v4434_v34, %v2199_v2  ;;  %v2179_v44 = vadd.f32 %v2178_v4, %v4428_v36 }
 0x3b9   : > { %v2228_v22 = vadd.f32 %v2227_v12, %v4432_v59  ;;  %v2291_v3 = vadd.f32 %v4471_v57, %v2150_v21 }
 0x3ba   : > { %v2301_v10 = vmax.f32 %v2269_v38, 0.0  ;;  %v2292_v20 = vadd.f32 %v4471_v57, %v2179_v44 }
 0x3bb   : > { %v2270_v23 = vadd.f32 %v4434_v34, %v2228_v22  ;;  %v2323_v55 = vmax.f32 %v2291_v3, 0.0 }
 0x3bc   : > { %2333 = vst [vmem:[%s4442_s26 + $0x30] sm:$0xff] %v2301_v10  ;;  %v2324_v45 = vmax.f32 %v2292_v20, 0.0 }
 0x3bd   : > { %v2302_v43 = vmax.f32 %v2270_v23, 0.0  ;;  %2355 = vst [vmem:[%s4442_s26 + $0xe0] sm:$0xff] %v2323_v55  ;;  %v2201_v47 = vpop.f32.mrf.mxu0 }
 0x3be   : > { %2356 = vst [vmem:[%s4442_s26 + $0xe8] sm:$0xff] %v2324_v45  ;;  %v2202_v36 = vadd.f32 %v2201_v47, %v4444_v46 }
 0x3bf   : > { %2334 = vst [vmem:[%s4442_s26 + $0x38] sm:$0xff] %v2302_v43 }
 0x3c0   : > { %v2230_v59 = vpop.f32.mrf.mxu1  ;;  %v2277_v13 = vadd.f32 %v4450_v29, %v2202_v36 }
 0x3c1   : > { %v2231_v30 = vadd.f32 %v2230_v59, %v4446_v51 }
 0x3c2   : > { %v2309_v9 = vmax.f32 %v2277_v13, 0.0 }
 0x3c3   : > { %v2278_v34 = vadd.f32 %v4450_v29, %v2231_v30 }
 0x3c4   : > { %2341 = vst [vmem:[%s4442_s26 + $0x70] sm:$0xff] %v2309_v9 }
 0x3c5   : > { %v2310_v49 = vmax.f32 %v2278_v34, 0.0  ;;  %v2204_v37 = vpop.f32.mrf.mxu0 }
 0x3c6   : > { %v2205_v1 = vadd.f32 %v2204_v37, %v4454_v56 }
 0x3c7   : > { %2342 = vst [vmem:[%s4442_s26 + $0x78] sm:$0xff] %v2310_v49 }
 0x3c8   : > { %v2233_v61 = vpop.f32.mrf.mxu1  ;;  %v2285_v46 = vadd.f32 %v4462_v63, %v2205_v1 }
 0x3c9   : > { %v2234_v0 = vadd.f32 %v2233_v61, %v4456_v41 }
 0x3ca   : > { %v2317_v17 = vmax.f32 %v2285_v46, 0.0 }
 0x3cb   : > { %v2286_v51 = vadd.f32 %v4462_v63, %v2234_v0 }
 0x3cc   : > { %2349 = vst [vmem:[%s4442_s26 + $0xb0] sm:$0xff] %v2317_v17 }
 0x3cd   : > { %v2318_v54 = vmax.f32 %v2286_v51, 0.0  ;;  %v2207_v18 = vpop.f32.mrf.mxu0 }
 0x3ce   : > { %v2208_v29 = vadd.f32 %v2207_v18, %v4466_v6 }
 0x3cf   : > { %2350 = vst [vmem:[%s4442_s26 + $0xb8] sm:$0xff] %v2318_v54 }
 0x3d0   : > { %v2236_v33 = vpop.f32.mrf.mxu1  ;;  %v2293_v31 = vadd.f32 %v4471_v57, %v2208_v29 }
 0x3d1   : > { %v2237_v56 = vadd.f32 %v2236_v33, %v4468_v62 }
 0x3d2   : > { %v2325_v14 = vmax.f32 %v2293_v31, 0.0 }
 0x3d3   : > { %v2294_v28 = vadd.f32 %v4471_v57, %v2237_v56 }
 0x3d4   : > { %2357 = vst [vmem:[%s4442_s26 + $0xf0] sm:$0xff] %v2325_v14 }
 0x3d5   : > { %v2326_v39 = vmax.f32 %v2294_v28, 0.0 }
 0x3d7   : > { %2358 = vst [vmem:[%s4442_s26 + $0xf8] sm:$0xff] %v2326_v39 }
 0x3d8 PF: > { %s19_s30 = sadd.s32 1, %s2929_s30  }
 0x3d9   : > { %p16_p4 = scmp.ge.s32.totalorder %s19_s30, 4  }
 0x3db   :  { %18 = sbr.rel (!%p16_p4) target bundleno = 1 (0x1), region = 93 }

</bundles_post_ra>
